<compile_context>
chip_gen: v5e
topology: v5e:2x2
jax: 0.10.0
libtpu: 0.0.40
codegen_flags: <defaults>
</compile_context>

<pallas_src>
import jax
import jax.numpy as jnp
from jax import lax
from jax.experimental import pallas as pl
from jax.experimental.pallas import tpu as pltpu


def self_attention_kernel(x_ref, w_ref, b_ref, gamma_ref, out_ref, attn_ref):
    Bt, C, W = x_ref.shape
    Cqkv = w_ref.shape[0]
    Cq = (Cqkv - C) // 2
    mxu_dt = w_ref.dtype          # bf16 when the wrapper casts weights, else f32

    w = w_ref[...]                                 # (Cqkv, C) in MXU dtype
    b = b_ref[...].astype(jnp.float32)             # (Cqkv, 1) kept f32
    gamma = gamma_ref[0, 0]                        # scalar from SMEM

    # Static unroll over the batch tile: each iteration is pure 2D MXU work.
    for bi in range(Bt):
        x_f32 = x_ref[bi].astype(jnp.float32)      # (C, W) -- kept f32 for residual
        xm = x_f32.astype(mxu_dt)

        # Fused QKV projection: single (Cqkv, C) @ (C, W) matmul + stacked bias.
        qkv = jnp.dot(w, xm, preferred_element_type=jnp.float32) + b   # (Cqkv, W)
        q = qkv[:Cq]                               # (Cq, W)
        k = qkv[Cq:2 * Cq]                         # (Cq, W)
        v = qkv[2 * Cq:]                           # (C,  W)

        # scores[i, j] = sum_c q[c, i] * k[c, j] -- contract the channel axis
        # directly (no explicit transpose before the MXU).
        scores = lax.dot_general(
            q.astype(mxu_dt), k.astype(mxu_dt),
            dimension_numbers=(((0,), (0,)), ((), ())),
            preferred_element_type=jnp.float32)    # (W, W)

        # Numerically stable softmax over the last dim (matches nn.Softmax(dim=-1)).
        scores = scores - jnp.max(scores, axis=-1, keepdims=True)
        e = jnp.exp(scores)
        inv_denom = pl.reciprocal(jnp.sum(e, axis=-1, keepdims=True), approx=True)
        attn = e * inv_denom                       # (W, W)

        # out[c, w] = sum_j v[c, j] * attn[j, w]   (torch.bmm(value, attention))
        out = jnp.dot(v.astype(mxu_dt), attn.astype(mxu_dt),
                      preferred_element_type=jnp.float32)               # (C, W)

        out_ref[bi] = (gamma * out + x_f32).astype(out_ref.dtype)
        attn_ref[bi] = attn.astype(attn_ref.dtype)


def self_attention(x, wq, bq, wk, bk, wv, bv, gamma, *,
                   batch_tile=4, mxu_dtype=None):
    B, C, W = x.shape
    Cq = wq.shape[0]
    Cqkv = 2 * Cq + C

    # Fuse the three 1x1-conv projections into one stacked weight / bias.
    w_qkv = jnp.concatenate([wq, wk, wv], axis=0)          # (Cqkv, C)
    b_qkv = jnp.concatenate([bq, bk, bv], axis=0)          # (Cqkv, 1)
    if mxu_dtype is not None:
        w_qkv = w_qkv.astype(mxu_dtype)                    # bf16 MXU operand path

    # Batch elements per grid step (must divide B).
    bt = max(1, min(batch_tile, B))
    while B % bt:
        bt -= 1

    out, attn = pl.pallas_call(
        self_attention_kernel,
        out_shape=(
            jax.ShapeDtypeStruct((B, C, W), x.dtype),
            jax.ShapeDtypeStruct((B, W, W), jnp.float32),
        ),
        grid=(B // bt,),
        in_specs=[
            pl.BlockSpec((bt, C, W), lambda i: (i, 0, 0)),      # x (batch tile)
            pl.BlockSpec((Cqkv, C), lambda i: (0, 0)),          # stacked W_qkv
            pl.BlockSpec((Cqkv, 1), lambda i: (0, 0)),          # stacked b_qkv
            pl.BlockSpec(memory_space=pltpu.MemorySpace.SMEM),  # gamma (1,1) scalar
        ],
        out_specs=(
            pl.BlockSpec((bt, C, W), lambda i: (i, 0, 0)),      # out
            pl.BlockSpec((bt, W, W), lambda i: (i, 0, 0)),      # attention
        ),
        compiler_params=pltpu.CompilerParams(
            dimension_semantics=("parallel",),      # batch is fully independent
            vmem_limit_bytes=48 * 1024 * 1024),
    )(x, w_qkv, b_qkv, gamma)
    return out, attn


def reference(x, wq, bq, wk, bk, wv, bv, gamma):
    # Pure-JAX reference mirroring the PyTorch forward.
    q = jnp.einsum('oc,bcw->bow', wq, x) + bq[None]
    k = jnp.einsum('oc,bcw->bow', wk, x) + bk[None]
    v = jnp.einsum('oc,bcw->bow', wv, x) + bv[None]
    scores = jnp.einsum('bci,bcj->bij', q, k)
    attn = jax.nn.softmax(scores, axis=-1)
    out = jnp.einsum('bcj,bjw->bcw', v, attn)
    out = gamma[0, 0] * out + x
    return out, attn


if __name__ == "__main__":
    # in_dim = 16  ->  query/key out-channels = 2.  W = 128 keeps stores lane-dense.
    B, C, W = 8, 16, 128
    Cq = C // 8

    key = jax.random.PRNGKey(0)
    kx, k1, k2, k3, k4, k5, k6 = jax.random.split(key, 7)

    x = jax.random.normal(kx, (B, C, W), dtype=jnp.float32)

    # Deterministic parameter init (shapes from the module's __init__).
    wq = jax.random.normal(k1, (Cq, C), dtype=jnp.float32) * 0.1
    bq = jax.random.normal(k2, (Cq, 1), dtype=jnp.float32) * 0.1
    wk = jax.random.normal(k3, (Cq, C), dtype=jnp.float32) * 0.1
    bk = jax.random.normal(k4, (Cq, 1), dtype=jnp.float32) * 0.1
    wv = jax.random.normal(k5, (C, C), dtype=jnp.float32) * 0.1
    bv = jax.random.normal(k6, (C, 1), dtype=jnp.float32) * 0.1
    # PyTorch inits gamma to 0 (making out == x); use a nonzero value here so
    # the full attention path is exercised.
    gamma = jnp.array([[0.5]], dtype=jnp.float32)

    ref_out, ref_attn = reference(x, wq, bq, wk, bk, wv, bv, gamma)

    # Default path: f32 MXU operands, f32 everywhere (right config for v5e).
    out, attn = self_attention(x, wq, bq, wk, bk, wv, bv, gamma, batch_tile=4)
    jax.block_until_ready((out, attn))
    assert jnp.allclose(out, ref_out, atol=2e-3, rtol=2e-3)
    assert jnp.allclose(attn, ref_attn, atol=2e-3, rtol=2e-3)

    # bf16 MXU-operand path (v6e/v7x): f32 accumulation / softmax / residual kept.
    out_bf, attn_bf = self_attention(x, wq, bq, wk, bk, wv, bv, gamma,
                                     batch_tile=4, mxu_dtype=jnp.bfloat16)
    jax.block_until_ready((out_bf, attn_bf))
    assert jnp.allclose(out_bf, ref_out, atol=6e-2, rtol=6e-2)
    assert jnp.allclose(attn_bf, ref_attn, atol=6e-2, rtol=6e-2)

    print("KERNEL_OK")
</pallas_src>

<mosaic_0001>
module attributes {stable_mosaic.version = 11 : i64} {
  func.func @self_attention_kernel(%arg0: i32, %arg1: memref<4x16x128xf32, #tpu.memory_space<vmem>>, %arg2: memref<20x16xf32, #tpu.memory_space<vmem>>, %arg3: memref<20x1xf32, #tpu.memory_space<vmem>>, %arg4: memref<1x1xf32, #tpu.memory_space<smem>>, %arg5: memref<4x16x128xf32, #tpu.memory_space<vmem>>, %arg6: memref<4x128x128xf32, #tpu.memory_space<vmem>>) attributes {dimension_semantics = [#tpu.dimension_semantics<parallel>], iteration_bounds = array<i64: 2>, scalar_prefetch = 0 : i64, scratch_operands = 0 : i64, tpu.core_type = #tpu.core_type<tc>, window_params = [{transform_indices = @transform_0, window_bounds = array<i64: 4, 16, 128>}, {pipeline_mode = #tpu.pipeline_mode<synchronous>, transform_indices = @transform_1, window_bounds = array<i64: 20, 16>}, {pipeline_mode = #tpu.pipeline_mode<synchronous>, transform_indices = @transform_2, window_bounds = array<i64: 20, 1>}, {transform_indices = @transform_3, window_bounds = array<i64: 1, 1>}, {transform_indices = @transform_4, window_bounds = array<i64: 4, 16, 128>}, {transform_indices = @transform_5, window_bounds = array<i64: 4, 128, 128>}]} {
    %c0 = arith.constant 0 : index
    %c0_0 = arith.constant 0 : index
    %0 = vector.load %arg2[%c0, %c0_0] : memref<20x16xf32, #tpu.memory_space<vmem>>, vector<20x16xf32>
    %c0_1 = arith.constant 0 : index
    %c0_2 = arith.constant 0 : index
    %1 = vector.load %arg3[%c0_1, %c0_2] : memref<20x1xf32, #tpu.memory_space<vmem>>, vector<20x1xf32>
    %c0_3 = arith.constant 0 : index
    %c0_4 = arith.constant 0 : index
    %2 = memref.load %arg4[%c0_3, %c0_4] : memref<1x1xf32, #tpu.memory_space<smem>>
    %c0_5 = arith.constant 0 : index
    %c0_6 = arith.constant 0 : index
    %c0_7 = arith.constant 0 : index
    %3 = vector.load %arg1[%c0_5, %c0_6, %c0_7] : memref<4x16x128xf32, #tpu.memory_space<vmem>>, vector<1x16x128xf32>
    %4 = vector.shape_cast %3 : vector<1x16x128xf32> to vector<16x128xf32>
    %cst = arith.constant dense<0.000000e+00> : vector<20x128xf32>
    %5 = tpu.matmul %0, %4, %cst {dimension_numbers = #tpu.dot_dimension_numbers<[1], [0], [0], [1], [0, 0, 1, 1], [], []>} : vector<20x16xf32>, vector<16x128xf32>, vector<20x128xf32> -> vector<20x128xf32>
    %6 = vector.broadcast %1 : vector<20x1xf32> to vector<20x128xf32>
    %7 = arith.addf %5, %6 : vector<20x128xf32>
    %8 = vector.extract_strided_slice %7 {offsets = [0, 0], sizes = [2, 128], strides = [1, 1]} : vector<20x128xf32> to vector<2x128xf32>
    %9 = vector.extract_strided_slice %7 {offsets = [2, 0], sizes = [2, 128], strides = [1, 1]} : vector<20x128xf32> to vector<2x128xf32>
    %10 = vector.extract_strided_slice %7 {offsets = [4, 0], sizes = [16, 128], strides = [1, 1]} : vector<20x128xf32> to vector<16x128xf32>
    %cst_8 = arith.constant dense<0.000000e+00> : vector<128x128xf32>
    %11 = tpu.matmul %8, %9, %cst_8 {dimension_numbers = #tpu.dot_dimension_numbers<[0], [0], [1], [1], [0, 1, 1, 1], [], []>} : vector<2x128xf32>, vector<2x128xf32>, vector<128x128xf32> -> vector<128x128xf32>
    %cst_9 = arith.constant dense<0xFF800000> : vector<128xf32>
    %12 = vector.multi_reduction <maximumf>, %11, %cst_9 [1] : vector<128x128xf32> to vector<128xf32>
    %13 = vector.shape_cast %12 : vector<128xf32> to vector<128x1xf32>
    %14 = vector.broadcast %13 : vector<128x1xf32> to vector<128x128xf32>
    %15 = arith.subf %11, %14 : vector<128x128xf32>
    %16 = math.exp %15 : vector<128x128xf32>
    %cst_10 = arith.constant dense<0.000000e+00> : vector<128xf32>
    %17 = vector.multi_reduction <add>, %16, %cst_10 [1] : vector<128x128xf32> to vector<128xf32>
    %18 = vector.shape_cast %17 : vector<128xf32> to vector<128x1xf32>
    %19 = tpu.reciprocal %18 {approx = true} : vector<128x1xf32> -> vector<128x1xf32>
    %20 = vector.broadcast %19 : vector<128x1xf32> to vector<128x128xf32>
    %21 = arith.mulf %16, %20 : vector<128x128xf32>
    %cst_11 = arith.constant dense<0.000000e+00> : vector<16x128xf32>
    %22 = tpu.matmul %10, %21, %cst_11 {dimension_numbers = #tpu.dot_dimension_numbers<[1], [0], [0], [1], [0, 0, 1, 1], [], []>} : vector<16x128xf32>, vector<128x128xf32>, vector<16x128xf32> -> vector<16x128xf32>
    %23 = vector.broadcast %2 : f32 to vector<16x128xf32>
    %24 = arith.mulf %23, %22 : vector<16x128xf32>
    %25 = arith.addf %24, %4 : vector<16x128xf32>
    %c0_12 = arith.constant 0 : index
    %c0_13 = arith.constant 0 : index
    %c0_14 = arith.constant 0 : index
    %26 = vector.load %arg5[%c0_12, %c0_13, %c0_14] : memref<4x16x128xf32, #tpu.memory_space<vmem>>, vector<1x16x128xf32>
    %27 = vector.shape_cast %26 : vector<1x16x128xf32> to vector<16x128xf32>
    %28 = vector.shape_cast %25 : vector<16x128xf32> to vector<1x16x128xf32>
    tpu.vector_store %arg5[%c0_12, %c0_13, %c0_14], %28 {strides = array<i32>} : memref<4x16x128xf32, #tpu.memory_space<vmem>>, vector<1x16x128xf32>,
    %c0_15 = arith.constant 0 : index
    %c0_16 = arith.constant 0 : index
    %c0_17 = arith.constant 0 : index
    %29 = vector.load %arg6[%c0_15, %c0_16, %c0_17] : memref<4x128x128xf32, #tpu.memory_space<vmem>>, vector<1x128x128xf32>
    %30 = vector.shape_cast %29 : vector<1x128x128xf32> to vector<128x128xf32>
    %31 = vector.shape_cast %21 : vector<128x128xf32> to vector<1x128x128xf32>
    tpu.vector_store %arg6[%c0_15, %c0_16, %c0_17], %31 {strides = array<i32>} : memref<4x128x128xf32, #tpu.memory_space<vmem>>, vector<1x128x128xf32>,
    %c1 = arith.constant 1 : index
    %c0_18 = arith.constant 0 : index
    %c0_19 = arith.constant 0 : index
    %32 = vector.load %arg1[%c1, %c0_18, %c0_19] : memref<4x16x128xf32, #tpu.memory_space<vmem>>, vector<1x16x128xf32>
    %33 = vector.shape_cast %32 : vector<1x16x128xf32> to vector<16x128xf32>
    %cst_20 = arith.constant dense<0.000000e+00> : vector<20x128xf32>
    %34 = tpu.matmul %0, %33, %cst_20 {dimension_numbers = #tpu.dot_dimension_numbers<[1], [0], [0], [1], [0, 0, 1, 1], [], []>} : vector<20x16xf32>, vector<16x128xf32>, vector<20x128xf32> -> vector<20x128xf32>
    %35 = vector.broadcast %1 : vector<20x1xf32> to vector<20x128xf32>
    %36 = arith.addf %34, %35 : vector<20x128xf32>
    %37 = vector.extract_strided_slice %36 {offsets = [0, 0], sizes = [2, 128], strides = [1, 1]} : vector<20x128xf32> to vector<2x128xf32>
    %38 = vector.extract_strided_slice %36 {offsets = [2, 0], sizes = [2, 128], strides = [1, 1]} : vector<20x128xf32> to vector<2x128xf32>
    %39 = vector.extract_strided_slice %36 {offsets = [4, 0], sizes = [16, 128], strides = [1, 1]} : vector<20x128xf32> to vector<16x128xf32>
    %cst_21 = arith.constant dense<0.000000e+00> : vector<128x128xf32>
    %40 = tpu.matmul %37, %38, %cst_21 {dimension_numbers = #tpu.dot_dimension_numbers<[0], [0], [1], [1], [0, 1, 1, 1], [], []>} : vector<2x128xf32>, vector<2x128xf32>, vector<128x128xf32> -> vector<128x128xf32>
    %cst_22 = arith.constant dense<0xFF800000> : vector<128xf32>
    %41 = vector.multi_reduction <maximumf>, %40, %cst_22 [1] : vector<128x128xf32> to vector<128xf32>
    %42 = vector.shape_cast %41 : vector<128xf32> to vector<128x1xf32>
    %43 = vector.broadcast %42 : vector<128x1xf32> to vector<128x128xf32>
    %44 = arith.subf %40, %43 : vector<128x128xf32>
    %45 = math.exp %44 : vector<128x128xf32>
    %cst_23 = arith.constant dense<0.000000e+00> : vector<128xf32>
    %46 = vector.multi_reduction <add>, %45, %cst_23 [1] : vector<128x128xf32> to vector<128xf32>
    %47 = vector.shape_cast %46 : vector<128xf32> to vector<128x1xf32>
    %48 = tpu.reciprocal %47 {approx = true} : vector<128x1xf32> -> vector<128x1xf32>
    %49 = vector.broadcast %48 : vector<128x1xf32> to vector<128x128xf32>
    %50 = arith.mulf %45, %49 : vector<128x128xf32>
    %cst_24 = arith.constant dense<0.000000e+00> : vector<16x128xf32>
    %51 = tpu.matmul %39, %50, %cst_24 {dimension_numbers = #tpu.dot_dimension_numbers<[1], [0], [0], [1], [0, 0, 1, 1], [], []>} : vector<16x128xf32>, vector<128x128xf32>, vector<16x128xf32> -> vector<16x128xf32>
    %52 = vector.broadcast %2 : f32 to vector<16x128xf32>
    %53 = arith.mulf %52, %51 : vector<16x128xf32>
    %54 = arith.addf %53, %33 : vector<16x128xf32>
    %c1_25 = arith.constant 1 : index
    %c0_26 = arith.constant 0 : index
    %c0_27 = arith.constant 0 : index
    %55 = vector.load %arg5[%c1_25, %c0_26, %c0_27] : memref<4x16x128xf32, #tpu.memory_space<vmem>>, vector<1x16x128xf32>
    %56 = vector.shape_cast %55 : vector<1x16x128xf32> to vector<16x128xf32>
    %57 = vector.shape_cast %54 : vector<16x128xf32> to vector<1x16x128xf32>
    tpu.vector_store %arg5[%c1_25, %c0_26, %c0_27], %57 {strides = array<i32>} : memref<4x16x128xf32, #tpu.memory_space<vmem>>, vector<1x16x128xf32>,
    %c1_28 = arith.constant 1 : index
    %c0_29 = arith.constant 0 : index
    %c0_30 = arith.constant 0 : index
    %58 = vector.load %arg6[%c1_28, %c0_29, %c0_30] : memref<4x128x128xf32, #tpu.memory_space<vmem>>, vector<1x128x128xf32>
    %59 = vector.shape_cast %58 : vector<1x128x128xf32> to vector<128x128xf32>
    %60 = vector.shape_cast %50 : vector<128x128xf32> to vector<1x128x128xf32>
    tpu.vector_store %arg6[%c1_28, %c0_29, %c0_30], %60 {strides = array<i32>} : memref<4x128x128xf32, #tpu.memory_space<vmem>>, vector<1x128x128xf32>,
    %c2 = arith.constant 2 : index
    %c0_31 = arith.constant 0 : index
    %c0_32 = arith.constant 0 : index
    %61 = vector.load %arg1[%c2, %c0_31, %c0_32] : memref<4x16x128xf32, #tpu.memory_space<vmem>>, vector<1x16x128xf32>
    %62 = vector.shape_cast %61 : vector<1x16x128xf32> to vector<16x128xf32>
    %cst_33 = arith.constant dense<0.000000e+00> : vector<20x128xf32>
    %63 = tpu.matmul %0, %62, %cst_33 {dimension_numbers = #tpu.dot_dimension_numbers<[1], [0], [0], [1], [0, 0, 1, 1], [], []>} : vector<20x16xf32>, vector<16x128xf32>, vector<20x128xf32> -> vector<20x128xf32>
    %64 = vector.broadcast %1 : vector<20x1xf32> to vector<20x128xf32>
    %65 = arith.addf %63, %64 : vector<20x128xf32>
    %66 = vector.extract_strided_slice %65 {offsets = [0, 0], sizes = [2, 128], strides = [1, 1]} : vector<20x128xf32> to vector<2x128xf32>
    %67 = vector.extract_strided_slice %65 {offsets = [2, 0], sizes = [2, 128], strides = [1, 1]} : vector<20x128xf32> to vector<2x128xf32>
    %68 = vector.extract_strided_slice %65 {offsets = [4, 0], sizes = [16, 128], strides = [1, 1]} : vector<20x128xf32> to vector<16x128xf32>
    %cst_34 = arith.constant dense<0.000000e+00> : vector<128x128xf32>
    %69 = tpu.matmul %66, %67, %cst_34 {dimension_numbers = #tpu.dot_dimension_numbers<[0], [0], [1], [1], [0, 1, 1, 1], [], []>} : vector<2x128xf32>, vector<2x128xf32>, vector<128x128xf32> -> vector<128x128xf32>
    %cst_35 = arith.constant dense<0xFF800000> : vector<128xf32>
    %70 = vector.multi_reduction <maximumf>, %69, %cst_35 [1] : vector<128x128xf32> to vector<128xf32>
    %71 = vector.shape_cast %70 : vector<128xf32> to vector<128x1xf32>
    %72 = vector.broadcast %71 : vector<128x1xf32> to vector<128x128xf32>
    %73 = arith.subf %69, %72 : vector<128x128xf32>
    %74 = math.exp %73 : vector<128x128xf32>
    %cst_36 = arith.constant dense<0.000000e+00> : vector<128xf32>
    %75 = vector.multi_reduction <add>, %74, %cst_36 [1] : vector<128x128xf32> to vector<128xf32>
    %76 = vector.shape_cast %75 : vector<128xf32> to vector<128x1xf32>
    %77 = tpu.reciprocal %76 {approx = true} : vector<128x1xf32> -> vector<128x1xf32>
    %78 = vector.broadcast %77 : vector<128x1xf32> to vector<128x128xf32>
    %79 = arith.mulf %74, %78 : vector<128x128xf32>
    %cst_37 = arith.constant dense<0.000000e+00> : vector<16x128xf32>
    %80 = tpu.matmul %68, %79, %cst_37 {dimension_numbers = #tpu.dot_dimension_numbers<[1], [0], [0], [1], [0, 0, 1, 1], [], []>} : vector<16x128xf32>, vector<128x128xf32>, vector<16x128xf32> -> vector<16x128xf32>
    %81 = vector.broadcast %2 : f32 to vector<16x128xf32>
    %82 = arith.mulf %81, %80 : vector<16x128xf32>
    %83 = arith.addf %82, %62 : vector<16x128xf32>
    %c2_38 = arith.constant 2 : index
    %c0_39 = arith.constant 0 : index
    %c0_40 = arith.constant 0 : index
    %84 = vector.load %arg5[%c2_38, %c0_39, %c0_40] : memref<4x16x128xf32, #tpu.memory_space<vmem>>, vector<1x16x128xf32>
    %85 = vector.shape_cast %84 : vector<1x16x128xf32> to vector<16x128xf32>
    %86 = vector.shape_cast %83 : vector<16x128xf32> to vector<1x16x128xf32>
    tpu.vector_store %arg5[%c2_38, %c0_39, %c0_40], %86 {strides = array<i32>} : memref<4x16x128xf32, #tpu.memory_space<vmem>>, vector<1x16x128xf32>,
    %c2_41 = arith.constant 2 : index
    %c0_42 = arith.constant 0 : index
    %c0_43 = arith.constant 0 : index
    %87 = vector.load %arg6[%c2_41, %c0_42, %c0_43] : memref<4x128x128xf32, #tpu.memory_space<vmem>>, vector<1x128x128xf32>
    %88 = vector.shape_cast %87 : vector<1x128x128xf32> to vector<128x128xf32>
    %89 = vector.shape_cast %79 : vector<128x128xf32> to vector<1x128x128xf32>
    tpu.vector_store %arg6[%c2_41, %c0_42, %c0_43], %89 {strides = array<i32>} : memref<4x128x128xf32, #tpu.memory_space<vmem>>, vector<1x128x128xf32>,
    %c3 = arith.constant 3 : index
    %c0_44 = arith.constant 0 : index
    %c0_45 = arith.constant 0 : index
    %90 = vector.load %arg1[%c3, %c0_44, %c0_45] : memref<4x16x128xf32, #tpu.memory_space<vmem>>, vector<1x16x128xf32>
    %91 = vector.shape_cast %90 : vector<1x16x128xf32> to vector<16x128xf32>
    %cst_46 = arith.constant dense<0.000000e+00> : vector<20x128xf32>
    %92 = tpu.matmul %0, %91, %cst_46 {dimension_numbers = #tpu.dot_dimension_numbers<[1], [0], [0], [1], [0, 0, 1, 1], [], []>} : vector<20x16xf32>, vector<16x128xf32>, vector<20x128xf32> -> vector<20x128xf32>
    %93 = vector.broadcast %1 : vector<20x1xf32> to vector<20x128xf32>
    %94 = arith.addf %92, %93 : vector<20x128xf32>
    %95 = vector.extract_strided_slice %94 {offsets = [0, 0], sizes = [2, 128], strides = [1, 1]} : vector<20x128xf32> to vector<2x128xf32>
    %96 = vector.extract_strided_slice %94 {offsets = [2, 0], sizes = [2, 128], strides = [1, 1]} : vector<20x128xf32> to vector<2x128xf32>
    %97 = vector.extract_strided_slice %94 {offsets = [4, 0], sizes = [16, 128], strides = [1, 1]} : vector<20x128xf32> to vector<16x128xf32>
    %cst_47 = arith.constant dense<0.000000e+00> : vector<128x128xf32>
    %98 = tpu.matmul %95, %96, %cst_47 {dimension_numbers = #tpu.dot_dimension_numbers<[0], [0], [1], [1], [0, 1, 1, 1], [], []>} : vector<2x128xf32>, vector<2x128xf32>, vector<128x128xf32> -> vector<128x128xf32>
    %cst_48 = arith.constant dense<0xFF800000> : vector<128xf32>
    %99 = vector.multi_reduction <maximumf>, %98, %cst_48 [1] : vector<128x128xf32> to vector<128xf32>
    %100 = vector.shape_cast %99 : vector<128xf32> to vector<128x1xf32>
    %101 = vector.broadcast %100 : vector<128x1xf32> to vector<128x128xf32>
    %102 = arith.subf %98, %101 : vector<128x128xf32>
    %103 = math.exp %102 : vector<128x128xf32>
    %cst_49 = arith.constant dense<0.000000e+00> : vector<128xf32>
    %104 = vector.multi_reduction <add>, %103, %cst_49 [1] : vector<128x128xf32> to vector<128xf32>
    %105 = vector.shape_cast %104 : vector<128xf32> to vector<128x1xf32>
    %106 = tpu.reciprocal %105 {approx = true} : vector<128x1xf32> -> vector<128x1xf32>
    %107 = vector.broadcast %106 : vector<128x1xf32> to vector<128x128xf32>
    %108 = arith.mulf %103, %107 : vector<128x128xf32>
    %cst_50 = arith.constant dense<0.000000e+00> : vector<16x128xf32>
    %109 = tpu.matmul %97, %108, %cst_50 {dimension_numbers = #tpu.dot_dimension_numbers<[1], [0], [0], [1], [0, 0, 1, 1], [], []>} : vector<16x128xf32>, vector<128x128xf32>, vector<16x128xf32> -> vector<16x128xf32>
    %110 = vector.broadcast %2 : f32 to vector<16x128xf32>
    %111 = arith.mulf %110, %109 : vector<16x128xf32>
    %112 = arith.addf %111, %91 : vector<16x128xf32>
    %c3_51 = arith.constant 3 : index
    %c0_52 = arith.constant 0 : index
    %c0_53 = arith.constant 0 : index
    %113 = vector.load %arg5[%c3_51, %c0_52, %c0_53] : memref<4x16x128xf32, #tpu.memory_space<vmem>>, vector<1x16x128xf32>
    %114 = vector.shape_cast %113 : vector<1x16x128xf32> to vector<16x128xf32>
    %115 = vector.shape_cast %112 : vector<16x128xf32> to vector<1x16x128xf32>
    tpu.vector_store %arg5[%c3_51, %c0_52, %c0_53], %115 {strides = array<i32>} : memref<4x16x128xf32, #tpu.memory_space<vmem>>, vector<1x16x128xf32>,
    %c3_54 = arith.constant 3 : index
    %c0_55 = arith.constant 0 : index
    %c0_56 = arith.constant 0 : index
    %116 = vector.load %arg6[%c3_54, %c0_55, %c0_56] : memref<4x128x128xf32, #tpu.memory_space<vmem>>, vector<1x128x128xf32>
    %117 = vector.shape_cast %116 : vector<1x128x128xf32> to vector<128x128xf32>
    %118 = vector.shape_cast %108 : vector<128x128xf32> to vector<1x128x128xf32>
    tpu.vector_store %arg6[%c3_54, %c0_55, %c0_56], %118 {strides = array<i32>} : memref<4x128x128xf32, #tpu.memory_space<vmem>>, vector<1x128x128xf32>,
    return
  }
  func.func @transform_0(%arg0: i32) -> (i32, i32, i32) {
    %c0_i32 = arith.constant 0 : i32
    %c0_i32_0 = arith.constant 0 : i32
    %c0_i32_1 = arith.constant 0 : i32
    return %arg0, %c0_i32, %c0_i32_0 : i32, i32, i32
  }
  func.func @transform_1(%arg0: i32) -> (i32, i32) {
    %c0_i32 = arith.constant 0 : i32
    %c0_i32_0 = arith.constant 0 : i32
    %c0_i32_1 = arith.constant 0 : i32
    return %c0_i32, %c0_i32_0 : i32, i32
  }
  func.func @transform_2(%arg0: i32) -> (i32, i32) {
    %c0_i32 = arith.constant 0 : i32
    %c0_i32_0 = arith.constant 0 : i32
    %c0_i32_1 = arith.constant 0 : i32
    return %c0_i32, %c0_i32_0 : i32, i32
  }
  func.func @transform_3(%arg0: i32) -> (i32, i32) {
    %c0_i32 = arith.constant 0 : i32
    %c0_i32_0 = arith.constant 0 : i32
    %c0_i32_1 = arith.constant 0 : i32
    return %c0_i32, %c0_i32_0 : i32, i32
  }
  func.func @transform_4(%arg0: i32) -> (i32, i32, i32) {
    %c0_i32 = arith.constant 0 : i32
    %c0_i32_0 = arith.constant 0 : i32
    %c0_i32_1 = arith.constant 0 : i32
    return %arg0, %c0_i32, %c0_i32_0 : i32, i32, i32
  }
  func.func @transform_5(%arg0: i32) -> (i32, i32, i32) {
    %c0_i32 = arith.constant 0 : i32
    %c0_i32_0 = arith.constant 0 : i32
    %c0_i32_1 = arith.constant 0 : i32
    return %arg0, %c0_i32, %c0_i32_0 : i32, i32, i32
  }
}

</mosaic_0001>

<bundles_post_ra>
// kernel: tpu_custom_call.1
= control target key start
LH: loop header
LB: loop body
LE: loop exit
PB: predicated region body
PF: predicated region fallthrough
CT: control target
= control target key end

     0   :  { %s3614_s0 = inlined_call_operand.hbm [shape: f32[8,16,128], index: 0, kind: input, shape index: {}]   ;;  %s3615_s1 = inlined_call_operand.vmem [shape: f32[20,16], index: 1, kind: input, shape index: {}]   ;;  %s3616_s2 = inlined_call_operand.vmem [shape: f32[20,1], index: 2, kind: input, shape index: {}]   ;;  %s3617_s3 = inlined_call_operand.<no memory space> [shape: f32[1,1], index: 3, kind: input, shape index: {}]   ;;  %s3618_s4 = inlined_call_operand.hbm [shape: f32[8,16,128], index: 4, kind: output, shape index: {0}]   ;;  %s3619_s5 = inlined_call_operand.hbm [shape: f32[8,128,128], index: 5, kind: output, shape index: {1}]  }
   0x1   :  { %3625 = sst [smem:[#allocation20_spill]] %s3614_s0 }
   0x2   :  { %11 = sst [smem:[#allocation2]] %s3617_s3 }
   0x3   :  { %12 = vsyncpa [#allocation4], 0 }
   0x4   :  { %14 = vsyncpa [#allocation4 + $0x1], 0 }
   0x5   :  { %15 = vsyncpa [#allocation5], 0 }
   0x6   :  { %17 = vsyncpa [#allocation5 + $0x1], 0 }
   0x7   :  { %18 = vsyncpa [#allocation8], 0 }
   0x8   :  { %20 = vsyncpa [#allocation8 + $0x1], 0  ;;  %s2609_s20 = smov 0   ;;  %s2611_s21 = smov 0  }
   0x9   :  { %s2613_s22 = smov 0   ;;  %s2615_s23 = smov 0  }
   0xa LB: > { %s2630_s3 = sadd.s32 4294967295, %s2569_s23   ;;  %s1952_s24 = sadd.s32 4294967294, %s2569_s23   ;;  %s2569_s23 = sphi %s2615_s23, %s3652_s23   ;;  %s2565_s22 = sphi %s2613_s22, %s3651_s22   ;;  %s2561_s21 = sphi %s2611_s21, %s3650_s21   ;;  %s2557_s20 = sphi %s2609_s20, %s3649_s20  }
   0xb   : > { %s2634_s25 = sadd.s32 1, %s2569_s23   ;;  %s33_s26 = sadd.s32 1, %s2565_s22 }
   0xc   : > { %s30_s27 = ssub.s32 %s2569_s23, %s2634_s25  ;;  %p40_p0 = scmp.ne.s32.totalorder %s2565_s22, %s2561_s21 }
   0xd   : > { %p31_p1 = scmp.eq.s32.totalorder %s30_s27, 0  ;;  %p41_p2 = scmp.eq.s32.totalorder %s2569_s23, 0 }
   0xe   : > { %p46_p3 = scmp.ne.s32.totalorder %s2561_s21, %s2557_s20  ;;  %p47_p4 = scmp.eq.s32.totalorder %s2630_s3, 0 }
   0xf   : > { %s2646_s28 = scalar_select %p31_p1, %s2565_s22, %s33_s26  }
  0x10   : > { %p2648_p5 = por %p41_p2, %p40_p0  ;;  %p2652_p6 = por %p47_p4, %p46_p3 }
  0x11   : > { %p133_p7 = scmp.eq.s32.totalorder %s2630_s3, 1  ;;  %p139_p8 = scmp.eq.s32.totalorder %s1952_s24, 1 }
  0x12   : > { %p2136_p10 = scmp.lt.s32.totalorder %s2569_s23, 2  ;;  %s194_s8 = sand.u32 1, %s2565_s22  }
  0x13   : > { %p2659_p11 = por %p133_p7, %p40_p0  ;;  %p2663_p12 = por %p139_p8, %p46_p3 }
  0x14   : > { %s2114_s9 = sshll.u32 %s2569_s23, 6  ;;  %s1955_s10 = sshll.u32 %s194_s8, 6 }
  0x15   : > { %s3630_s0 = sld [smem:[#allocation20_spill]]  ;;  %s198_s15 = scalar_lea.vmem [#allocation3], %s1955_s10 }
  0x16   : > { %s207_s16 = sshll.u32 %s198_s15, 4  ;;  %p2674_p13 = pnand %p2136_p10, %p2648_p5  ;;  %s208_s16 = int_to_ptr.vmem [resolvable:$true] %s207_s16 }
  0x17   : > { %p1959_p0 = scmp.ge.s32.totalorder %s2569_s23, 1  ;;  %p215_p1 = scmp.lt.s32.totalorder %s2569_s23, 3 }
  0x18   : > { %s195_s18 = scalar_lea.sflag [#allocation4], %s194_s8  ;;  %p2445_p3 = pneg %p2674_p13 }
  0x1b   : > { %s204_s13 = scalar_lea.hbm %s3630_s0, %s2114_s9  ;;  %s2448_s29 = scalar_lea.hbm %s3630_s0, 128 }
  0x1c   : > { %s205_s14 = sshll.u32 %s204_s13, 4  ;;  %s206_s14 = int_to_ptr.hbm [resolvable:$true] %s205_s14 }
  0x1d   : > { %s2441_s19 = sshra.s32 %s206_s14, 4  ;;  %s2442_s19 = int_to_ptr.hbm [resolvable:$true] %s2441_s19 }
  0x1e   : > { %s2443_s24 = scalar_lea.hbm %s2442_s19, 64  ;;  %p2449_p5 = scmp.lt.s32.totalorder %s2442_s19, %s3630_s0 }
  0x1f   : > { %p2444_p2 = scmp.ne.s32.totalorder %s2442_s19, %s2443_s24  ;;  %p2450_p8 = scmp.lt.s32.totalorder %s2448_s29, %s2443_s24 }
  0x21   : > { %p2446_p4 = pnand %p2445_p3, %p2444_p2  ;;  %p2451_p10 = por %p2450_p8, %p2449_p5 }
  0x23   : > { %p2447_p7 = pneg %p2446_p4 }
  0x25   : > { %p2452_p9 = pnand %p2451_p10, %p2447_p7 }
  0x27   : > { %2455 = shalt.err (!%p2452_p9)
}
  0x28   : > { %s2571_s8 = smov 128   ;;  %s2572_s11 = smov 8  }
  0x29   : > { %2128 = dma.hbm_to_vmem [thread:$0]  (!%p2674_p13), %s206_s14, 1024, %s208_s16, %s195_s18, %s2571_s8, %s2571_s8, %s2572_s11  }
  0x2a   : > { %p216_p2 = pnand %p1959_p0, %p215_p1 }
  0x2c   : > { %219 = sbr.rel (%p216_p2) target bundleno = 1970 (0x7b2), region = 36 }
  0x31   : > { %s2695_s12 = sand.u32 1, %s2561_s21  }
  0x32   : > { %s1960_s13 = sshll.u32 %s2695_s12, 6  ;;  %s222_s15 = scalar_lea.sflag [#allocation4], %s2695_s12 }
  0x33   : > { %s2701_s19 = scalar_lea.vmem [#allocation3], %s1960_s13 }
  0x34   : > { %2544 = dma.done.wait (%p2652_p6), %s222_s15, 1024  }
  0x35   : > { %2546 = vsyncadd (%p2652_p6), %s222_s15, 4294966272  ;;  %v2573_v0 = vmov 0   ;;  %v269_v1 = vld [vmem:[%s2701_s19 + $0x8] sm:$0xff]  ;;  %v2709_v2 = vld [vmem:[%s2701_s19 + $0x18] sm:$0xff]  ;;  %vm285_vm0 = vcmask 130048   ;;  %vm404_vm1 = vcmask 1041408  }
  0x36   : > { %2176 = vset.pattern.permute.xlu0 %v2573_v0  ;;  %2177 = vset.pattern.permute.xlu1 %v2573_v0  ;;  %v2024_v3 = vld [vmem:[%s2701_s19 + $0x28] sm:$0xff]  ;;  %v268_v4 = vld [vmem:[%s2701_s19] sm:$0xff]  ;;  %v2715_v5 = vld [vmem:[%s2701_s19 + $0x10] sm:$0xff]  ;;  %vm355_vm2 = vcmask 15360   ;;  %s1962_s11 = sshll.u32 %s2695_s12, 9  ;;  %vm618_vm3 = vcmask 1043456  }
  0x37   : > { %2178 = vset.pattern.permute.xlu2 %v2573_v0  ;;  %309 = vmatpush.msra.mxu0 %v269_v1  ;;  %v2023_v6 = vld [vmem:[%s2701_s19 + $0x20] sm:$0xff]  ;;  %v265_v9 = vld [vmem:[%s3616_s2 + $0x8] sm:$0xff]  ;;  %v2064_v10 = vld [vmem:[%s2701_s19 + $0x38] sm:$0xff]  ;;  %s2887_s15 = scalar_lea.vmem [#allocation7], %s1962_s11  ;;  %s267_s30 = sld [smem:[#allocation2]] }
  0x38   : > { %689 = vmatpush.msra.mxu3 %v2709_v2  ;;  %1067 = vmatpush.msra.mxu2 %v2024_v3  ;;  %v261_v7 = vld [vmem:[%s3615_s1] sm:$0xff]  ;;  %v2063_v11 = vld [vmem:[%s2701_s19 + $0x30] sm:$0xff]  ;;  %v262_v12 = vld [vmem:[%s3615_s1 + $0x8] sm:$0xff]  ;;  %s2967_s14 = scalar_lea.vmem [#allocation6], %s1960_s13  ;;  %s2118_s13 = sshll.u32 %s2630_s3, 9 }
  0x39   : > { %310 = vmatpush.msra.mxu0 %v268_v4  ;;  %v264_v8 = vld [vmem:[%s3616_s2] sm:$0xff]  ;;  %277 = vperm.xlu1 %2177, %v265_v9   ;;  %v263_v13 = vld [vmem:[%s3615_s1 + $0x10] sm:$0xf]  ;;  %s1842_s18 = scalar_lea.hbm %s3619_s5, %s2118_s13  ;;  %s1843_s24 = sshll.u32 %s2887_s15, 4  ;;  %s1844_s24 = int_to_ptr.vmem [resolvable:$true] %s1843_s24 }
  0x3a   : > { %690 = vmatpush.msra.mxu3 %v2715_v5  ;;  %1068 = vmatpush.msra.mxu2 %v2023_v6  ;;  %v266_v58 = vld [vmem:[%s3616_s2 + $0x10] sm:$0xf]  ;;  %s1845_s26 = sshll.u32 %s1842_s18, 4  ;;  %s1812_s27 = scalar_lea.sflag [#allocation8], %s2695_s12  ;;  %s1846_s26 = int_to_ptr.hbm [resolvable:$true] %s1845_s26 }
  0x3b   : > { %1963 = vmatmul.msk.f32.vlgmr.msra.gmra.mxu0 %vm285_vm0, %v261_v7  ;;  %1985 = vmatmul.msk.f32.vlgmr.msra.gmra.mxu3 %vm285_vm0, %v261_v7  ;;  %s2485_s29 = sshra.s32 %s1846_s26, 4  ;;  %s2491_s11 = scalar_lea.hbm %s3619_s5, 1024  ;;  %s2486_s29 = int_to_ptr.hbm [resolvable:$true] %s2485_s29 }
  0x3c   : > { %2025 = vmatmul.msk.f32.vlgmr.msra.gmra.mxu2 %vm285_vm0, %v261_v7  ;;  %272 = vperm.xlu0 %2176, %v264_v8   ;;  %s2487_s9 = scalar_lea.hbm %s2486_s29, 512  ;;  %p2492_p0 = scmp.lt.s32.totalorder %s2486_s29, %s3619_s5 }
  0x3d   : > { %1445 = vmatpush.msrb.mxu2 %v2064_v10  ;;  %p2488_p6 = scmp.ne.s32.totalorder %s2486_s29, %s2487_s9  ;;  %p2493_p1 = scmp.lt.s32.totalorder %s2491_s11, %s2487_s9 }
  0x3f   : > { %1446 = vmatpush.msrb.mxu2 %v2063_v11  ;;  %p2489_p9 = pnand %p2488_p6, %p2659_p11  ;;  %p2494_p3 = por %p2493_p1, %p2492_p0 }
  0x41   : > { %p2490_p13 = pneg %p2489_p9 }
  0x43   : > { %1964 = vmatmul.msk.f32.gmra.mxu0 %vm285_vm0, %v262_v12  ;;  %1986 = vmatmul.msk.f32.gmra.mxu3 %vm285_vm0, %v262_v12  ;;  %p2495_p4 = pnand %p2494_p3, %p2490_p13 }
  0x44   : > { %2026 = vmatmul.msk.f32.gmra.mxu2 %vm285_vm0, %v262_v12 }
  0x4b   : > { %1965 = vmatmul.msk.f32.gmra.mxu0 %vm285_vm0, %v263_v13  ;;  %1987 = vmatmul.msk.f32.gmra.mxu3 %vm285_vm0, %v263_v13 }
  0x4c   : > { %2027 = vmatmul.msk.f32.gmra.mxu2 %vm285_vm0, %v263_v13 }
  0x54   : > { %2065 = vmatmul.msk.f32.vlgmr.msrb.gmra.mxu2 %vm285_vm0, %v261_v7 }
  0x5c   : > { %2066 = vmatmul.msk.f32.gmra.mxu2 %vm285_vm0, %v262_v12 }
  0x64   : > { %2067 = vmatmul.msk.f32.gmra.mxu2 %vm285_vm0, %v263_v13 }
  0xab   : > { %v2818_v62 = vpop.permute.xlu1 %277 }
  0xae   : > { %v2748_v14 = vpop.permute.xlu0 %272 }
  0xb8   : > { %v312_v15 = vpop.f32.mrf.mxu0 }
  0xb9   : > { %v2751_v16 = vadd.f32 %v312_v15, %v2748_v14 }
  0xbb   : > { %v354_v17 = vrot.slane %v2751_v16, 2 }
  0xbd   : > { %1966 = vmatpush.msk.msra.mxu1 %vm404_vm1, %v354_v17 }
  0xbe   : > { %v692_v18 = vpop.f32.mrf.mxu3 }
  0xbf   : > { %v2755_v19 = vpop.f32.mrf.mxu2  ;;  %v2758_v20 = vadd.f32 %v692_v18, %v2748_v14 }
  0xc0   : > { %v2786_v41 = vpop.f32.mrf.mxu0 }
  0xc1   : > { %701 = vxpose.xlu0.b32.start.end [1/1] (short) %v2758_v20, 128  ;;  %v734_v21 = vrot.slane %v2758_v20, 2 }
  0xc3   : > { %1988 = vmatpush.msk.msrb.mxu0 %vm404_vm1, %v734_v21 }
  0xc7   : > { %v2763_v22 = vpop.f32.mrf.mxu2 }
  0xc8   : > { %3632 = vst [vmem:[#allocation12_spill] sm:$0xff] %v2763_v22  ;;  %v2789_v43 = vpop.f32.mrf.mxu0 }
  0xcf   : > { %v2765_v23 = vpop.f32.mrf.mxu2 }
  0xd0   : > { %3633 = vst [vmem:[#allocation13_spill] sm:$0xff] %v2765_v23 }
  0xd7   : > { %v1448_v24 = vpop.f32.mrf.mxu2 }
  0xd8   : > { %v2768_v25 = vadd.f32 %v1448_v24, %v2748_v14 }
  0xda   : > { %3634 = vst [vmem:[#allocation14_spill] sm:$0xff] %v2768_v25  ;;  %v1490_v26 = vrot.slane %v2768_v25, 2 }
  0xdc   : > { %2068 = vmatpush.msk.msra.mxu2 %vm404_vm1, %v1490_v26 }
 0x165   : > { %v717_v27 = vpop.trf.xlu0 }
 0x166   : > { %1989 = vmatmul.msk.f32.vlgmr.msrb.gmra.mxu0 %vm355_vm2, %v717_v27 }
 0x16d   : > { %v718_v28 = vpop.trf.xlu0 }
 0x16e   : > { %1990 = vmatmul.msk.f32.gmra.mxu0 %vm355_vm2, %v718_v28 }
 0x175   : > { %v719_v29 = vpop.trf.xlu0 }
 0x176   : > { %1991 = vmatmul.msk.f32.gmra.mxu0 %vm355_vm2, %v719_v29 }
 0x17d   : > { %v720_v30 = vpop.trf.xlu0 }
 0x17e   : > { %1992 = vmatmul.msk.f32.gmra.mxu0 %vm355_vm2, %v720_v30 }
 0x185   : > { %v721_v31 = vpop.trf.xlu0 }
 0x186   : > { %1993 = vmatmul.msk.f32.gmra.mxu0 %vm355_vm2, %v721_v31 }
 0x18d   : > { %v722_v32 = vpop.trf.xlu0 }
 0x18e   : > { %1994 = vmatmul.msk.f32.gmra.mxu0 %vm355_vm2, %v722_v32 }
 0x195   : > { %v723_v33 = vpop.trf.xlu0 }
 0x196   : > { %1995 = vmatmul.msk.f32.gmra.mxu0 %vm355_vm2, %v723_v33 }
 0x19d   : > { %v724_v34 = vpop.trf.xlu0 }
 0x19e   : > { %1996 = vmatmul.msk.f32.gmra.mxu0 %vm355_vm2, %v724_v34 }
 0x1a5   : > { %v725_v35 = vpop.trf.xlu0 }
 0x1a6   : > { %1997 = vmatmul.msk.f32.gmra.mxu0 %vm355_vm2, %v725_v35 }
 0x1ad   : > { %v726_v36 = vpop.trf.xlu0 }
 0x1ae   : > { %1998 = vmatmul.msk.f32.gmra.mxu0 %vm355_vm2, %v726_v36 }
 0x1b5   : > { %v727_v37 = vpop.trf.xlu0 }
 0x1b6   : > { %1999 = vmatmul.msk.f32.gmra.mxu0 %vm355_vm2, %v727_v37 }
 0x1bd   : > { %v728_v38 = vpop.trf.xlu0 }
 0x1be   : > { %2000 = vmatmul.msk.f32.gmra.mxu0 %vm355_vm2, %v728_v38 }
 0x1c5   : > { %v729_v39 = vpop.trf.xlu0 }
 0x1c6   : > { %2001 = vmatmul.msk.f32.gmra.mxu0 %vm355_vm2, %v729_v39 }
 0x1cd   : > { %v730_v40 = vpop.trf.xlu0 }
 0x1ce   : > { %2002 = vmatmul.msk.f32.gmra.mxu0 %vm355_vm2, %v730_v40 }
 0x1d5   : > { %v731_v42 = vpop.trf.xlu0 }
 0x1d6   : > { %2003 = vmatmul.msk.f32.gmra.mxu0 %vm355_vm2, %v731_v42 }
 0x1dd   : > { %v732_v44 = vpop.trf.xlu0 }
 0x1de   : > { %2004 = vmatmul.msk.f32.gmra.mxu0 %vm355_vm2, %v732_v44 }
 0x1e3   : > { %v802_v45 = vpop.f32.mrf.mxu0 }
 0x1eb   : > { %v805_v46 = vpop.f32.mrf.mxu0 }
 0x1f3   : > { %v808_v47 = vpop.f32.mrf.mxu0 }
 0x1fb   : > { %v811_v48 = vpop.f32.mrf.mxu0 }
 0x203   : > { %v814_v49 = vpop.f32.mrf.mxu0 }
 0x20b   : > { %v817_v50 = vpop.f32.mrf.mxu0 }
 0x213   : > { %v820_v51 = vpop.f32.mrf.mxu0 }
 0x214   : > { %862 = vmax.xlane.f32.xlu1 %v820_v51 }
 0x21b   : > { %v2792_v52 = vpop.f32.mrf.mxu0 }
 0x21c   : > { %858 = vmax.xlane.f32.xlu1 %v814_v49  ;;  %864 = vmax.xlane.f32.xlu2 %v2792_v52 }
 0x223   : > { %v2795_v53 = vpop.f32.mrf.mxu0 }
 0x224   : > { %854 = vmax.xlane.f32.xlu1 %v808_v47  ;;  %860 = vmax.xlane.f32.xlu2 %v817_v50 }
 0x225   : > { %866 = vmax.xlane.f32.xlu0 %v2795_v53 }
 0x22b   : > { %v2798_v54 = vpop.f32.mrf.mxu0 }
 0x22c   : > { %850 = vmax.xlane.f32.xlu1 %v802_v45  ;;  %856 = vmax.xlane.f32.xlu2 %v811_v48 }
 0x233   : > { %v2800_v55 = vpop.f32.mrf.mxu0 }
 0x234   : > { %852 = vmax.xlane.f32.xlu2 %v805_v46 }
 0x23b   : > { %v2802_v56 = vpop.f32.mrf.mxu0 }
 0x243   : > { %v2804_v57 = vpop.f32.mrf.mxu0 }
 0x24b   : > { %v2809_v59 = vpop.f32.mrf.mxu0 }
 0x24c   : > { %282 = vperm.xlu2 %2178, %v266_v58  }
 0x253   : > { %v2811_v60 = vpop.f32.mrf.mxu0 }
 0x25b   : > { %v2813_v61 = vpop.f32.mrf.mxu0 }
 0x25c   : > { %880 = vmax.xlane.f32.xlu1 %v2813_v61 }
 0x275   : > { %868 = vmax.xlane.f32.xlu2 %v2798_v54 }
 0x27d   : > { %870 = vmax.xlane.f32.xlu2 %v2800_v55 }
 0x285   : > { %872 = vmax.xlane.f32.xlu2 %v2802_v56 }
 0x287   : > { %v863_v63 = vpop.xlane.xlu1 %862 }
 0x288   : > { %v888_v29 = vsub.f32 %v820_v51, %v863_v63 }
 0x28a   : > { %v910_v31 = vmul.f32 1.442695, %v888_v29 }
 0x28d   : > { %874 = vmax.xlane.f32.xlu2 %v2804_v57 }
 0x28f   : > { %v859_v0 = vpop.xlane.xlu1 %858  ;;  %v865_v1 = vpop.xlane.xlu2 %864 }
 0x290   : > { %v886_v18 = vsub.f32 %v814_v49, %v859_v0  ;;  %v889_v36 = vsub.f32 %v2792_v52, %v865_v1 }
 0x292   : > { %v906_v24 = vmul.f32 1.442695, %v886_v18  ;;  %v912_v38 = vmul.f32 1.442695, %v889_v36 }
 0x295   : > { %876 = vmax.xlane.f32.xlu2 %v2809_v59 }
 0x297   : > { %v855_v3 = vpop.xlane.xlu1 %854  ;;  %v861_v4 = vpop.xlane.xlu2 %860 }
 0x298   : > { %v884_v10 = vsub.f32 %v808_v47, %v855_v3  ;;  %v887_v30 = vsub.f32 %v817_v50, %v861_v4  ;;  %v867_v34 = vpop.xlane.xlu0 %866 }
 0x299   : > { %v890_v37 = vsub.f32 %v2795_v53, %v867_v34 }
 0x29a   : > { %v902_v11 = vmul.f32 1.442695, %v884_v10  ;;  %v908_v32 = vmul.f32 1.442695, %v887_v30 }
 0x29b   : > { %v914_v39 = vmul.f32 1.442695, %v890_v37 }
 0x29d   : > { %878 = vmax.xlane.f32.xlu2 %v2811_v60 }
 0x29f   : > { %v851_v6 = vpop.xlane.xlu1 %850  ;;  %v857_v7 = vpop.xlane.xlu2 %856 }
 0x2a0   : > { %v882_v8 = vsub.f32 %v802_v45, %v851_v6  ;;  %v885_v21 = vsub.f32 %v811_v48, %v857_v7 }
 0x2a2   : > { %v898_v9 = vmul.f32 1.442695, %v882_v8  ;;  %v904_v26 = vmul.f32 1.442695, %v885_v21 }
 0x2a4   : > { %2179 = vpow2.f32 %v898_v9 }
 0x2a5   : > { %2181 = vpow2.f32 %v902_v11 }
 0x2a7   : > { %v853_v12 = vpop.xlane.xlu2 %852 }
 0x2a8   : > { %v883_v13 = vsub.f32 %v805_v46, %v853_v12 }
 0x2aa   : > { %v2824_v15 = vpop.eup %2179  ;;  %v900_v17 = vmul.f32 1.442695, %v883_v13 }
 0x2ab   : > { %930 = vadd.xlane.f32.xlu1 %v2824_v15  ;;  %v2827_v27 = vpop.eup %2181 }
 0x2ac   : > { %2183 = vpow2.f32 %v900_v17 }
 0x2ad   : > { %2185 = vpow2.f32 %v906_v24 }
 0x2ae   : > { %2187 = vpow2.f32 %v904_v26 }
 0x2af   : > { %2189 = vpow2.f32 %v910_v31  ;;  %v2853_v46 = vpop.permute.xlu2 %282 }
 0x2b0   : > { %2191 = vpow2.f32 %v908_v32 }
 0x2b1   : > { %2193 = vpow2.f32 %v912_v38 }
 0x2b2   : > { %v2829_v28 = vpop.eup %2183  ;;  %2195 = vpow2.f32 %v914_v39 }
 0x2b3   : > { %932 = vadd.xlane.f32.xlu2 %v2829_v28  ;;  %934 = vadd.xlane.f32.xlu1 %v2827_v27  ;;  %v2833_v33 = vpop.eup %2185 }
 0x2b4   : > { %v2835_v35 = vpop.eup %2187 }
 0x2b5   : > { %v2841_v40 = vpop.eup %2189 }
 0x2b6   : > { %v2843_v42 = vpop.eup %2191 }
 0x2b7   : > { %v2847_v44 = vpop.eup %2193 }
 0x2b8   : > { %v2849_v45 = vpop.eup %2195 }
 0x2bb   : > { %936 = vadd.xlane.f32.xlu2 %v2835_v35  ;;  %938 = vadd.xlane.f32.xlu1 %v2833_v33 }
 0x2c3   : > { %940 = vadd.xlane.f32.xlu2 %v2843_v42  ;;  %942 = vadd.xlane.f32.xlu1 %v2841_v40 }
 0x2cb   : > { %944 = vadd.xlane.f32.xlu2 %v2847_v44  ;;  %946 = vadd.xlane.f32.xlu1 %v2849_v45 }
 0x2cf   : > { %v881_v7 = vpop.xlane.xlu1 %880 }
 0x2d0   : > { %v897_v10 = vsub.f32 %v2813_v61, %v881_v7 }
 0x2e8   : > { %v869_v47 = vpop.xlane.xlu2 %868 }
 0x2e9   : > { %v891_v48 = vsub.f32 %v2798_v54, %v869_v47 }
 0x2eb   : > { %v916_v49 = vmul.f32 1.442695, %v891_v48 }
 0x2ed   : > { %2197 = vpow2.f32 %v916_v49 }
 0x2f0   : > { %v871_v50 = vpop.xlane.xlu2 %870 }
 0x2f1   : > { %v892_v51 = vsub.f32 %v2800_v55, %v871_v50 }
 0x2f3   : > { %v2857_v52 = vpop.eup %2197  ;;  %v918_v53 = vmul.f32 1.442695, %v892_v51 }
 0x2f4   : > { %948 = vadd.xlane.f32.xlu2 %v2857_v52 }
 0x2f5   : > { %2199 = vpow2.f32 %v918_v53 }
 0x2f8   : > { %v873_v58 = vpop.xlane.xlu2 %872 }
 0x2f9   : > { %v893_v63 = vsub.f32 %v2802_v56, %v873_v58 }
 0x2fb   : > { %v2861_v0 = vpop.eup %2199  ;;  %v920_v1 = vmul.f32 1.442695, %v893_v63 }
 0x2fc   : > { %950 = vadd.xlane.f32.xlu1 %v2861_v0 }
 0x2fd   : > { %2201 = vpow2.f32 %v920_v1 }
 0x300   : > { %v875_v54 = vpop.xlane.xlu2 %874 }
 0x301   : > { %v894_v3 = vsub.f32 %v2804_v57, %v875_v54  ;;  %v928_v57 = vmul.f32 1.442695, %v897_v10 }
 0x303   : > { %v2865_v4 = vpop.eup %2201  ;;  %v922_v55 = vmul.f32 1.442695, %v894_v3 }
 0x304   : > { %952 = vadd.xlane.f32.xlu2 %v2865_v4 }
 0x305   : > { %2203 = vpow2.f32 %v922_v55 }
 0x308   : > { %v877_v6 = vpop.xlane.xlu2 %876 }
 0x309   : > { %v895_v8 = vsub.f32 %v2809_v59, %v877_v6 }
 0x30b   : > { %v2869_v56 = vpop.eup %2203  ;;  %v924_v9 = vmul.f32 1.442695, %v895_v8 }
 0x30c   : > { %954 = vadd.xlane.f32.xlu1 %v2869_v56 }
 0x30d   : > { %2205 = vpow2.f32 %v924_v9 }
 0x30e   : > { %2207 = vpow2.f32 %v928_v57 }
 0x310   : > { %v879_v11 = vpop.xlane.xlu2 %878 }
 0x311   : > { %v896_v12 = vsub.f32 %v2811_v60, %v879_v11 }
 0x313   : > { %v2874_v13 = vpop.eup %2205  ;;  %v926_v17 = vmul.f32 1.442695, %v896_v12 }
 0x314   : > { %956 = vadd.xlane.f32.xlu2 %v2874_v13  ;;  %v2877_v59 = vpop.eup %2207 }
 0x315   : > { %2209 = vpow2.f32 %v926_v17 }
 0x31b   : > { %v2879_v18 = vpop.eup %2209 }
 0x31c   : > { %958 = vadd.xlane.f32.xlu1 %v2879_v18  ;;  %960 = vadd.xlane.f32.xlu2 %v2877_v59 }
 0x31e   : > { %v931_v61 = vpop.xlane.xlu1 %930 }
 0x31f   : > { %2211 = vrcp.f32 %v931_v61  ;;  %v996_v61 = vrot.slane %v2758_v20, 4 }
 0x325   : > { %v2212_v21 = vpop.eup %2211 }
 0x326   : > { %v933_v60 = vpop.xlane.xlu2 %932  ;;  %v935_v24 = vpop.xlane.xlu1 %934  ;;  %v2885_v26 = vmul.f32 %v2212_v21, %v2824_v15 }
 0x327   : > { %2213 = vrcp.f32 %v933_v60 }
 0x328   : > { %2215 = vrcp.f32 %v935_v24  ;;  %2007 = vst [vmem:[%s2887_s15 + $0x80] sm:$0xff] %v2885_v26 }
 0x32d   : > { %v2214_v29 = vpop.eup %2213 }
 0x32e   : > { %v2216_v30 = vpop.eup %2215  ;;  %v937_v31 = vpop.xlane.xlu2 %936  ;;  %v2892_v34 = vmul.f32 %v2214_v29, %v2829_v28 }
 0x32f   : > { %v939_v32 = vpop.xlane.xlu1 %938  ;;  %2217 = vrcp.f32 %v937_v31  ;;  %v2895_v15 = vmul.f32 %v2216_v30, %v2827_v27 }
 0x330   : > { %2219 = vrcp.f32 %v939_v32  ;;  %2008 = vst [vmem:[%s2887_s15 + $0x88] sm:$0xff] %v2892_v34 }
 0x331   : > { %2009 = vst [vmem:[%s2887_s15 + $0x90] sm:$0xff] %v2895_v15 }
 0x335   : > { %v2218_v36 = vpop.eup %2217 }
 0x336   : > { %v2220_v37 = vpop.eup %2219  ;;  %v941_v38 = vpop.xlane.xlu2 %940  ;;  %v2902_v47 = vmul.f32 %v2218_v36, %v2835_v35 }
 0x337   : > { %v943_v39 = vpop.xlane.xlu1 %942  ;;  %2221 = vrcp.f32 %v941_v38  ;;  %v2905_v28 = vmul.f32 %v2220_v37, %v2833_v33  ;;  %v2917_v33 = vadd.f32 %v2755_v19, %v2748_v14  ;;  %v2960_v38 = vstv %s267_s30 }
 0x338   : > { %2223 = vrcp.f32 %v943_v39  ;;  %2010 = vst [vmem:[%s2887_s15 + $0x98] sm:$0xff] %v2902_v47 }
 0x339   : > { %2011 = vst [vmem:[%s2887_s15 + $0xa0] sm:$0xff] %v2905_v28  ;;  %v1112_v21 = vrot.slane %v2917_v33, 2 }
 0x33a   : > { %3635 = vst [vmem:[#allocation15_spill] sm:$0xff] %v2917_v33 }
 0x33b   : > { %3636 = vst [vmem:[#allocation16_spill] sm:$0xff] %v2960_v38 }
 0x33d   : > { %v2222_v27 = vpop.eup %2221 }
 0x33e   : > { %v2224_v48 = vpop.eup %2223  ;;  %v945_v49 = vpop.xlane.xlu2 %944  ;;  %v983_v51 = vmul.f32 %v2222_v27, %v2843_v42 }
 0x33f   : > { %v947_v50 = vpop.xlane.xlu1 %946  ;;  %2225 = vrcp.f32 %v945_v49  ;;  %v984_v35 = vmul.f32 %v2224_v48, %v2841_v40 }
 0x340   : > { %2227 = vrcp.f32 %v947_v50  ;;  %2012 = vst [vmem:[%s2887_s15 + $0xa8] sm:$0xff] %v983_v51 }
 0x341   : > { %2013 = vst [vmem:[%s2887_s15 + $0xb0] sm:$0xff] %v984_v35 }
 0x345   : > { %v2226_v53 = vpop.eup %2225  ;;  %1079 = vxpose.xlu2.b32.start.end [1/1] (short) %v2917_v33, 128 }
 0x346   : > { %v2228_v58 = vpop.eup %2227  ;;  %v985_v63 = vmul.f32 %v2226_v53, %v2847_v44 }
 0x347   : > { %v986_v42 = vmul.f32 %v2228_v58, %v2849_v45 }
 0x348   : > { %2014 = vst [vmem:[%s2887_s15 + $0xb8] sm:$0xff] %v985_v63 }
 0x349   : > { %2015 = vst [vmem:[%s2887_s15 + $0xc0] sm:$0xff] %v986_v42 }
 0x356   : > { %321 = vxpose.xlu1.b32.start.end [1/1] (short) %v2751_v16, 128 }
 0x367   : > { %v949_v40 = vpop.xlane.xlu2 %948 }
 0x368   : > { %2229 = vrcp.f32 %v949_v40 }
 0x36e   : > { %v2230_v1 = vpop.eup %2229 }
 0x36f   : > { %v951_v54 = vpop.xlane.xlu1 %950  ;;  %v987_v14 = vmul.f32 %v2230_v1, %v2857_v52 }
 0x370   : > { %2231 = vrcp.f32 %v951_v54 }
 0x371   : > { %2016 = vst [vmem:[%s2887_s15 + $0xc8] sm:$0xff] %v987_v14 }
 0x376   : > { %v2232_v19 = vpop.eup %2231 }
 0x377   : > { %v953_v3 = vpop.xlane.xlu2 %952  ;;  %v988_v44 = vmul.f32 %v2232_v19, %v2861_v0 }
 0x378   : > { %2233 = vrcp.f32 %v953_v3 }
 0x379   : > { %2017 = vst [vmem:[%s2887_s15 + $0xd0] sm:$0xff] %v988_v44 }
 0x37e   : > { %v2234_v45 = vpop.eup %2233 }
 0x37f   : > { %v955_v55 = vpop.xlane.xlu1 %954  ;;  %v989_v6 = vmul.f32 %v2234_v45, %v2865_v4 }
 0x380   : > { %2235 = vrcp.f32 %v955_v55 }
 0x381   : > { %2018 = vst [vmem:[%s2887_s15 + $0xd8] sm:$0xff] %v989_v6 }
 0x386   : > { %v2236_v7 = vpop.eup %2235 }
 0x387   : > { %v957_v8 = vpop.xlane.xlu2 %956  ;;  %v990_v52 = vmul.f32 %v2236_v7, %v2869_v56  ;;  %v695_v56 = vpop.f32.mrf.mxu3 }
 0x388   : > { %2237 = vrcp.f32 %v957_v8 }
 0x389   : > { %2019 = vst [vmem:[%s2887_s15 + $0xe0] sm:$0xff] %v990_v52 }
 0x38e   : > { %v2238_v9 = vpop.eup %2237 }
 0x38f   : > { %v961_v10 = vpop.xlane.xlu2 %960  ;;  %v959_v0 = vpop.xlane.xlu1 %958  ;;  %v991_v57 = vmul.f32 %v2238_v9, %v2874_v13  ;;  %v696_v13 = vadd.f32 %v695_v56, %v2818_v62 }
 0x390   : > { %2239 = vrcp.f32 %v961_v10 }
 0x391   : > { %2241 = vrcp.f32 %v959_v0  ;;  %2020 = vst [vmem:[%s2887_s15 + $0xe8] sm:$0xff] %v991_v57 }
 0x396   : > { %v2240_v11 = vpop.eup %2239 }
 0x397   : > { %v2242_v4 = vpop.eup %2241  ;;  %v993_v12 = vmul.f32 %v2240_v11, %v2877_v59  ;;  %v997_v59 = vrot.slane %v696_v13, 4 }
 0x398   : > { %v992_v17 = vmul.f32 %v2242_v4, %v2879_v18  ;;  %v698_v18 = vpop.f32.mrf.mxu3 }
 0x399   : > { %1003 = vmatpush.msrb.mxu3 %v993_v12  ;;  %2022 = vst [vmem:[%s2887_s15 + $0xf8] sm:$0xff] %v993_v12  ;;  %v998_v60 = vsel %vm618_vm3, %v996_v61, %v997_v59  ;;  %v699_v24 = vadd.f32 %v698_v18, %v2853_v46 }
 0x39a   : > { %2021 = vst [vmem:[%s2887_s15 + $0xf0] sm:$0xff] %v992_v17 }
 0x39b   : > { %1004 = vmatpush.msrb.mxu3 %v992_v17  ;;  %v999_v29 = vrot.slane %v699_v24, 4 }
 0x39d   : > { %1005 = vmatpush.msrb.mxu3 %v991_v57  ;;  %v1000_v30 = vsel %vm618_vm3, %v997_v59, %v999_v29 }
 0x39f   : > { %1006 = vmatpush.msrb.mxu3 %v990_v52 }
 0x3a1   : > { %1007 = vmatpush.msrb.mxu3 %v989_v6 }
 0x3a3   : > { %1008 = vmatpush.msrb.mxu3 %v988_v44 }
 0x3a5   : > { %1009 = vmatpush.msrb.mxu3 %v987_v14 }
 0x3a7   : > { %1010 = vmatpush.msrb.mxu3 %v986_v42 }
 0x3a9   : > { %1011 = vmatpush.msrb.mxu3 %v985_v63 }
 0x3ab   : > { %1012 = vmatpush.msrb.mxu3 %v984_v35 }
 0x3ad   : > { %1013 = vmatpush.msrb.mxu3 %v983_v51 }
 0x3af   : > { %1014 = vmatpush.msrb.mxu3 %v2905_v28 }
 0x3b1   : > { %1015 = vmatpush.msrb.mxu3 %v2902_v47 }
 0x3b3   : > { %1016 = vmatpush.msrb.mxu3 %v2895_v15 }
 0x3b5   : > { %1017 = vmatpush.msrb.mxu3 %v2892_v34 }
 0x3b7   : > { %1018 = vmatpush.msrb.mxu3 %v2885_v26 }
 0x3b8   : > { %1019 = vmatmul.f32.vlgmr.msrb.gmra.mxu3 %v998_v60 }
 0x3b9   : > { %2028 = vmatpush.msk.msra.mxu3 %vm404_vm1, %v1112_v21 }
 0x3c0   : > { %1022 = vmatmul.f32.gmra.mxu3 %v1000_v30 }
 0x3d6   : > { %1457 = vxpose.xlu1.b32.start.end [1/1] (short) %v2768_v25, 128 }
 0x3de   : > { %v1095_v53 = vpop.trf.xlu2 }
 0x3df   : > { %2029 = vmatmul.msk.f32.vlgmr.msra.gmra.mxu3 %vm355_vm2, %v1095_v53 }
 0x3e6   : > { %v1096_v58 = vpop.trf.xlu2 }
 0x3e7   : > { %2030 = vmatmul.msk.f32.gmra.mxu3 %vm355_vm2, %v1096_v58 }
 0x3ee   : > { %v1097_v42 = vpop.trf.xlu2 }
 0x3ef   : > { %2031 = vmatmul.msk.f32.gmra.mxu3 %vm355_vm2, %v1097_v42 }
 0x3f6   : > { %v1098_v40 = vpop.trf.xlu2 }
 0x3f7   : > { %2032 = vmatmul.msk.f32.gmra.mxu3 %vm355_vm2, %v1098_v40 }
 0x3fa   : > { %v337_v20 = vpop.trf.xlu1 }
 0x3fb   : > { %1967 = vmatmul.msk.f32.vlgmr.msra.gmra.mxu1 %vm355_vm2, %v337_v20 }
 0x3fe   : > { %v1099_v54 = vpop.trf.xlu2 }
 0x3ff   : > { %2033 = vmatmul.msk.f32.gmra.mxu3 %vm355_vm2, %v1099_v54 }
 0x402   : > { %v338_v31 = vpop.trf.xlu1 }
 0x403   : > { %1968 = vmatmul.msk.f32.gmra.mxu1 %vm355_vm2, %v338_v31 }
 0x406   : > { %v1100_v19 = vpop.trf.xlu2 }
 0x407   : > { %2034 = vmatmul.msk.f32.gmra.mxu3 %vm355_vm2, %v1100_v19 }
 0x40a   : > { %v339_v26 = vpop.trf.xlu1 }
 0x40b   : > { %1969 = vmatmul.msk.f32.gmra.mxu1 %vm355_vm2, %v339_v26 }
 0x40e   : > { %v1101_v45 = vpop.trf.xlu2 }
 0x40f   : > { %2035 = vmatmul.msk.f32.gmra.mxu3 %vm355_vm2, %v1101_v45 }
 0x412   : > { %v340_v32 = vpop.trf.xlu1 }
 0x413   : > { %1970 = vmatmul.msk.f32.gmra.mxu1 %vm355_vm2, %v340_v32 }
 0x416   : > { %v1102_v7 = vpop.trf.xlu2 }
 0x417   : > { %2036 = vmatmul.msk.f32.gmra.mxu3 %vm355_vm2, %v1102_v7 }
 0x41a   : > { %v341_v34 = vpop.trf.xlu1 }
 0x41b   : > { %1971 = vmatmul.msk.f32.gmra.mxu1 %vm355_vm2, %v341_v34 }
 0x41e   : > { %v1103_v9 = vpop.trf.xlu2 }
 0x41f   : > { %2037 = vmatmul.msk.f32.gmra.mxu3 %vm355_vm2, %v1103_v9 }
 0x422   : > { %v342_v15 = vpop.trf.xlu1 }
 0x423   : > { %1972 = vmatmul.msk.f32.gmra.mxu1 %vm355_vm2, %v342_v15 }
 0x426   : > { %v1104_v57 = vpop.trf.xlu2 }
 0x427   : > { %2038 = vmatmul.msk.f32.gmra.mxu3 %vm355_vm2, %v1104_v57 }
 0x42a   : > { %v343_v36 = vpop.trf.xlu1 }
 0x42b   : > { %1973 = vmatmul.msk.f32.gmra.mxu1 %vm355_vm2, %v343_v36 }
 0x42e   : > { %v1105_v12 = vpop.trf.xlu2 }
 0x42f   : > { %2039 = vmatmul.msk.f32.gmra.mxu3 %vm355_vm2, %v1105_v12 }
 0x432   : > { %v344_v37 = vpop.trf.xlu1 }
 0x433   : > { %1974 = vmatmul.msk.f32.gmra.mxu1 %vm355_vm2, %v344_v37 }
 0x436   : > { %v1106_v13 = vpop.trf.xlu2 }
 0x437   : > { %2040 = vmatmul.msk.f32.gmra.mxu3 %vm355_vm2, %v1106_v13 }
 0x43a   : > { %v345_v39 = vpop.trf.xlu1 }
 0x43b   : > { %1975 = vmatmul.msk.f32.gmra.mxu1 %vm355_vm2, %v345_v39  ;;  %v1020_v47 = vpop.f32.mrf.mxu3 }
 0x43c   : > { %v1026_v28 = vmul.f32 %v1020_v47, %v2960_v38 }
 0x43e   : > { %v1028_v27 = vadd.f32 %v2715_v5, %v1026_v28  ;;  %v1107_v61 = vpop.trf.xlu2 }
 0x43f   : > { %2041 = vmatmul.msk.f32.gmra.mxu3 %vm355_vm2, %v1107_v61 }
 0x440   : > { %2005 = vst [vmem:[%s2967_s14 + $0x10] sm:$0xff] %v1028_v27 }
 0x442   : > { %v346_v48 = vpop.trf.xlu1 }
 0x443   : > { %1976 = vmatmul.msk.f32.gmra.mxu1 %vm355_vm2, %v346_v48  ;;  %v1023_v49 = vpop.f32.mrf.mxu3 }
 0x444   : > { %v1027_v50 = vmul.f32 %v1023_v49, %v2960_v38 }
 0x446   : > { %v1029_v51 = vadd.f32 %v2709_v2, %v1027_v50  ;;  %v1108_v24 = vpop.trf.xlu2 }
 0x447   : > { %2042 = vmatmul.msk.f32.gmra.mxu3 %vm355_vm2, %v1108_v24 }
 0x448   : > { %2006 = vst [vmem:[%s2967_s14 + $0x18] sm:$0xff] %v1029_v51 }
 0x44a   : > { %v347_v35 = vpop.trf.xlu1 }
 0x44b   : > { %1977 = vmatmul.msk.f32.gmra.mxu1 %vm355_vm2, %v347_v35  ;;  %v3057_v35 = vpop.f32.mrf.mxu2 }
 0x44c   : > { %3637 = vst [vmem:[#allocation17_spill] sm:$0xff] %v3057_v35 }
 0x44e   : > { %v1109_v20 = vpop.trf.xlu2 }
 0x44f   : > { %2043 = vmatmul.msk.f32.gmra.mxu3 %vm355_vm2, %v1109_v20 }
 0x452   : > { %v348_v5 = vpop.trf.xlu1 }
 0x453   : > { %1978 = vmatmul.msk.f32.gmra.mxu1 %vm355_vm2, %v348_v5 }
 0x456   : > { %v1110_v32 = vpop.trf.xlu2 }
 0x457   : > { %2044 = vmatmul.msk.f32.gmra.mxu3 %vm355_vm2, %v1110_v32 }
 0x45a   : > { %v349_v63 = vpop.trf.xlu1 }
 0x45b   : > { %1979 = vmatmul.msk.f32.gmra.mxu1 %vm355_vm2, %v349_v63 }
 0x462   : > { %v350_v2 = vpop.trf.xlu1  ;;  %v3080_v9 = vpop.f32.mrf.mxu3 }
 0x463   : > { %1980 = vmatmul.msk.f32.gmra.mxu1 %vm355_vm2, %v350_v2  ;;  %v3064_v2 = vpop.f32.mrf.mxu2 }
 0x464   : > { %3638 = vst [vmem:[#allocation18_spill] sm:$0xff] %v3064_v2 }
 0x46a   : > { %v351_v1 = vpop.trf.xlu1 }
 0x46b   : > { %1981 = vmatmul.msk.f32.gmra.mxu1 %vm355_vm2, %v351_v1 }
 0x472   : > { %v352_v14 = vpop.trf.xlu1 }
 0x473   : > { %1982 = vmatmul.msk.f32.gmra.mxu1 %vm355_vm2, %v352_v14 }
 0x478   : > { %v2986_v3 = vpop.f32.mrf.mxu1 }
 0x479   : > { %472 = vmax.xlane.f32.xlu2 %v2986_v3 }
 0x47a   : > { %v1473_v44 = vpop.trf.xlu1 }
 0x47b   : > { %2069 = vmatmul.msk.f32.vlgmr.msra.gmra.mxu2 %vm355_vm2, %v1473_v44 }
 0x480   : > { %v2991_v55 = vpop.f32.mrf.mxu1 }
 0x481   : > { %474 = vmax.xlane.f32.xlu0 %v2991_v55 }
 0x482   : > { %v1474_v6 = vpop.trf.xlu1 }
 0x483   : > { %2070 = vmatmul.msk.f32.gmra.mxu2 %vm355_vm2, %v1474_v6 }
 0x488   : > { %v2996_v8 = vpop.f32.mrf.mxu1 }
 0x489   : > { %476 = vmax.xlane.f32.xlu0 %v2996_v8 }
 0x48a   : > { %v1475_v52 = vpop.trf.xlu1 }
 0x48b   : > { %2071 = vmatmul.msk.f32.gmra.mxu2 %vm355_vm2, %v1475_v52 }
 0x490   : > { %v3001_v10 = vpop.f32.mrf.mxu1 }
 0x491   : > { %478 = vmax.xlane.f32.xlu0 %v3001_v10 }
 0x492   : > { %v1476_v0 = vpop.trf.xlu1 }
 0x493   : > { %2072 = vmatmul.msk.f32.gmra.mxu2 %vm355_vm2, %v1476_v0 }
 0x498   : > { %v3006_v11 = vpop.f32.mrf.mxu1 }
 0x499   : > { %480 = vmax.xlane.f32.xlu0 %v3006_v11 }
 0x49a   : > { %v1477_v4 = vpop.trf.xlu1 }
 0x49b   : > { %2073 = vmatmul.msk.f32.gmra.mxu2 %vm355_vm2, %v1477_v4 }
 0x4a0   : > { %v3011_v17 = vpop.f32.mrf.mxu1 }
 0x4a1   : > { %482 = vmax.xlane.f32.xlu0 %v3011_v17 }
 0x4a2   : > { %v1478_v56 = vpop.trf.xlu1 }
 0x4a3   : > { %2074 = vmatmul.msk.f32.gmra.mxu2 %vm355_vm2, %v1478_v56 }
 0x4a8   : > { %v3016_v59 = vpop.f32.mrf.mxu1 }
 0x4a9   : > { %484 = vmax.xlane.f32.xlu0 %v3016_v59 }
 0x4aa   : > { %v1479_v18 = vpop.trf.xlu1 }
 0x4ab   : > { %2075 = vmatmul.msk.f32.gmra.mxu2 %vm355_vm2, %v1479_v18 }
 0x4b0   : > { %v3021_v21 = vpop.f32.mrf.mxu1 }
 0x4b1   : > { %486 = vmax.xlane.f32.xlu0 %v3021_v21 }
 0x4b2   : > { %v1480_v60 = vpop.trf.xlu1 }
 0x4b3   : > { %2076 = vmatmul.msk.f32.gmra.mxu2 %vm355_vm2, %v1480_v60 }
 0x4b8   : > { %v3026_v29 = vpop.f32.mrf.mxu1 }
 0x4b9   : > { %488 = vmax.xlane.f32.xlu0 %v3026_v29 }
 0x4ba   : > { %v1481_v30 = vpop.trf.xlu1 }
 0x4bb   : > { %2077 = vmatmul.msk.f32.gmra.mxu2 %vm355_vm2, %v1481_v30 }
 0x4c0   : > { %v3031_v31 = vpop.f32.mrf.mxu1 }
 0x4c1   : > { %490 = vmax.xlane.f32.xlu1 %v3031_v31 }
 0x4c2   : > { %v1482_v26 = vpop.trf.xlu1 }
 0x4c3   : > { %2078 = vmatmul.msk.f32.gmra.mxu2 %vm355_vm2, %v1482_v26 }
 0x4c8   : > { %v3036_v34 = vpop.f32.mrf.mxu1 }
 0x4c9   : > { %492 = vmax.xlane.f32.xlu0 %v3036_v34 }
 0x4ca   : > { %v1483_v15 = vpop.trf.xlu1 }
 0x4cb   : > { %2079 = vmatmul.msk.f32.gmra.mxu2 %vm355_vm2, %v1483_v15 }
 0x4d0   : > { %v3040_v36 = vpop.f32.mrf.mxu1 }
 0x4d1   : > { %494 = vmax.xlane.f32.xlu0 %v3040_v36 }
 0x4d2   : > { %v1484_v37 = vpop.trf.xlu1 }
 0x4d3   : > { %2080 = vmatmul.msk.f32.gmra.mxu2 %vm355_vm2, %v1484_v37 }
 0x4d8   : > { %v3044_v39 = vpop.f32.mrf.mxu1 }
 0x4d9   : > { %496 = vmax.xlane.f32.xlu0 %v3044_v39 }
 0x4da   : > { %v1485_v47 = vpop.trf.xlu1 }
 0x4db   : > { %2081 = vmatmul.msk.f32.gmra.mxu2 %vm355_vm2, %v1485_v47 }
 0x4e0   : > { %v3048_v28 = vpop.f32.mrf.mxu1 }
 0x4e1   : > { %498 = vmax.xlane.f32.xlu0 %v3048_v28 }
 0x4e2   : > { %v1486_v27 = vpop.trf.xlu1 }
 0x4e3   : > { %2082 = vmatmul.msk.f32.gmra.mxu2 %vm355_vm2, %v1486_v27 }
 0x4e8   : > { %v3052_v48 = vpop.f32.mrf.mxu1 }
 0x4e9   : > { %500 = vmax.xlane.f32.xlu0 %v3052_v48 }
 0x4ea   : > { %v1487_v49 = vpop.trf.xlu1 }
 0x4eb   : > { %2083 = vmatmul.msk.f32.gmra.mxu2 %vm355_vm2, %v1487_v49 }
 0x4ec   : > { %v473_v50 = vpop.xlane.xlu2 %472 }
 0x4ed   : > { %v504_v51 = vsub.f32 %v2986_v3, %v473_v50 }
 0x4ef   : > { %v520_v53 = vmul.f32 1.442695, %v504_v51 }
 0x4f0   : > { %v3059_v5 = vpop.f32.mrf.mxu1 }
 0x4f1   : > { %2243 = vpow2.f32 %v520_v53  ;;  %502 = vmax.xlane.f32.xlu0 %v3059_v5 }
 0x4f2   : > { %v1488_v58 = vpop.trf.xlu1 }
 0x4f3   : > { %2084 = vmatmul.msk.f32.gmra.mxu2 %vm355_vm2, %v1488_v58 }
 0x4f4   : > { %v475_v63 = vpop.xlane.xlu0 %474 }
 0x4f5   : > { %v505_v42 = vsub.f32 %v2991_v55, %v475_v63 }
 0x4f7   : > { %v3066_v40 = vpop.eup %2243  ;;  %v522_v1 = vmul.f32 1.442695, %v505_v42 }
 0x4f9   : > { %2245 = vpow2.f32 %v522_v1  ;;  %552 = vadd.xlane.f32.xlu0 %v3066_v40 }
 0x4fc   : > { %v477_v54 = vpop.xlane.xlu0 %476 }
 0x4fd   : > { %v506_v14 = vsub.f32 %v2996_v8, %v477_v54 }
 0x4fe   : > { %v3070_v19 = vpop.f32.mrf.mxu2 }
 0x4ff   : > { %v3072_v3 = vpop.eup %2245  ;;  %v524_v44 = vmul.f32 1.442695, %v506_v14 }
 0x501   : > { %2247 = vpow2.f32 %v524_v44  ;;  %554 = vadd.xlane.f32.xlu0 %v3072_v3 }
 0x504   : > { %v479_v45 = vpop.xlane.xlu0 %478 }
 0x505   : > { %v507_v55 = vsub.f32 %v3001_v10, %v479_v45  ;;  %v3089_v10 = vpop.f32.mrf.mxu3 }
 0x506   : > { %v3076_v6 = vpop.f32.mrf.mxu2 }
 0x507   : > { %3639 = vst [vmem:[#allocation19_spill] sm:$0xff] %v3076_v6  ;;  %v3078_v7 = vpop.eup %2247  ;;  %v526_v52 = vmul.f32 1.442695, %v507_v55 }
 0x509   : > { %2249 = vpow2.f32 %v526_v52  ;;  %556 = vadd.xlane.f32.xlu0 %v3078_v7 }
 0x50c   : > { %v481_v8 = vpop.xlane.xlu0 %480 }
 0x50d   : > { %v508_v0 = vsub.f32 %v3006_v11, %v481_v8  ;;  %v3097_v24 = vpop.f32.mrf.mxu3 }
 0x50e   : > { %v3084_v57 = vpop.f32.mrf.mxu2 }
 0x50f   : > { %v3086_v4 = vpop.eup %2249  ;;  %v528_v12 = vmul.f32 1.442695, %v508_v0 }
 0x511   : > { %2251 = vpow2.f32 %v528_v12  ;;  %558 = vadd.xlane.f32.xlu0 %v3086_v4 }
 0x514   : > { %v483_v56 = vpop.xlane.xlu0 %482 }
 0x515   : > { %v509_v13 = vsub.f32 %v3011_v17, %v483_v56  ;;  %v3108_v47 = vpop.f32.mrf.mxu3 }
 0x516   : > { %v3092_v18 = vpop.f32.mrf.mxu2 }
 0x517   : > { %v3094_v61 = vpop.eup %2251  ;;  %v530_v60 = vmul.f32 1.442695, %v509_v13 }
 0x519   : > { %2253 = vpow2.f32 %v530_v60  ;;  %560 = vadd.xlane.f32.xlu0 %v3094_v61 }
 0x51c   : > { %v485_v11 = vpop.xlane.xlu0 %484 }
 0x51d   : > { %v510_v30 = vsub.f32 %v3016_v59, %v485_v11  ;;  %v3121_v58 = vpop.f32.mrf.mxu3 }
 0x51e   : > { %v3100_v20 = vpop.f32.mrf.mxu2 }
 0x51f   : > { %v3102_v26 = vpop.eup %2253  ;;  %v532_v32 = vmul.f32 1.442695, %v510_v30 }
 0x521   : > { %2255 = vpow2.f32 %v532_v32  ;;  %562 = vadd.xlane.f32.xlu0 %v3102_v26 }
 0x524   : > { %v487_v17 = vpop.xlane.xlu0 %486 }
 0x525   : > { %v511_v15 = vsub.f32 %v3021_v21, %v487_v17  ;;  %v3130_v14 = vpop.f32.mrf.mxu3 }
 0x526   : > { %v3106_v37 = vpop.f32.mrf.mxu2 }
 0x527   : > { %v3110_v27 = vpop.eup %2255  ;;  %v534_v49 = vmul.f32 1.442695, %v511_v15  ;;  %1616 = vmax.xlane.f32.xlu1 %v3106_v37 }
 0x529   : > { %2257 = vpow2.f32 %v534_v49  ;;  %564 = vadd.xlane.f32.xlu0 %v3110_v27 }
 0x52c   : > { %v489_v59 = vpop.xlane.xlu0 %488 }
 0x52d   : > { %v512_v50 = vsub.f32 %v3026_v29, %v489_v59  ;;  %v3139_v0 = vpop.f32.mrf.mxu3 }
 0x52e   : > { %v3115_v51 = vpop.f32.mrf.mxu2 }
 0x52f   : > { %v3117_v53 = vpop.eup %2257  ;;  %v536_v21 = vmul.f32 1.442695, %v512_v50  ;;  %1610 = vmax.xlane.f32.xlu1 %v3084_v57 }
 0x530   : > { %566 = vadd.xlane.f32.xlu2 %v3117_v53 }
 0x531   : > { %2259 = vpow2.f32 %v536_v21 }
 0x534   : > { %v491_v63 = vpop.xlane.xlu1 %490 }
 0x535   : > { %v513_v42 = vsub.f32 %v3031_v31, %v491_v63 }
 0x536   : > { %v3124_v1 = vpop.f32.mrf.mxu2 }
 0x537   : > { %v3126_v54 = vpop.eup %2259  ;;  %v538_v29 = vmul.f32 1.442695, %v513_v42  ;;  %1606 = vmax.xlane.f32.xlu1 %v3070_v19 }
 0x538   : > { %568 = vadd.xlane.f32.xlu0 %v3126_v54 }
 0x539   : > { %2261 = vpow2.f32 %v538_v29 }
 0x53c   : > { %v493_v44 = vpop.xlane.xlu0 %492 }
 0x53d   : > { %v514_v45 = vsub.f32 %v3036_v34, %v493_v44 }
 0x53e   : > { %v3133_v55 = vpop.f32.mrf.mxu2 }
 0x53f   : > { %v3135_v52 = vpop.eup %2261  ;;  %v540_v31 = vmul.f32 1.442695, %v514_v45  ;;  %1234 = vmax.xlane.f32.xlu1 %v3108_v47 }
 0x540   : > { %570 = vadd.xlane.f32.xlu2 %v3135_v52 }
 0x541   : > { %2263 = vpow2.f32 %v540_v31 }
 0x544   : > { %v495_v8 = vpop.xlane.xlu0 %494 }
 0x545   : > { %v515_v12 = vsub.f32 %v3040_v36, %v495_v8 }
 0x546   : > { %v3142_v56 = vpop.f32.mrf.mxu2 }
 0x547   : > { %v3144_v13 = vpop.eup %2263  ;;  %v542_v34 = vmul.f32 1.442695, %v515_v12  ;;  %1240 = vmax.xlane.f32.xlu1 %v3139_v0 }
 0x548   : > { %572 = vadd.xlane.f32.xlu0 %v3144_v13 }
 0x549   : > { %2265 = vpow2.f32 %v542_v34 }
 0x54c   : > { %v497_v60 = vpop.xlane.xlu0 %496 }
 0x54d   : > { %v516_v11 = vsub.f32 %v3044_v39, %v497_v60 }
 0x54e   : > { %v3149_v30 = vpop.f32.mrf.mxu2 }
 0x54f   : > { %v3151_v32 = vpop.eup %2265  ;;  %v544_v17 = vmul.f32 1.442695, %v516_v11 }
 0x550   : > { %574 = vadd.xlane.f32.xlu2 %v3151_v32 }
 0x551   : > { %2267 = vpow2.f32 %v544_v17 }
 0x554   : > { %v499_v36 = vpop.xlane.xlu0 %498 }
 0x555   : > { %v517_v15 = vsub.f32 %v3048_v28, %v499_v36 }
 0x556   : > { %v3155_v49 = vpop.f32.mrf.mxu2 }
 0x557   : > { %v3157_v59 = vpop.eup %2267  ;;  %v546_v50 = vmul.f32 1.442695, %v517_v15 }
 0x558   : > { %576 = vadd.xlane.f32.xlu0 %v3157_v59 }
 0x559   : > { %2269 = vpow2.f32 %v546_v50 }
 0x55c   : > { %v501_v39 = vpop.xlane.xlu0 %500 }
 0x55d   : > { %v518_v21 = vsub.f32 %v3052_v48, %v501_v39 }
 0x55e   : > { %v3161_v63 = vpop.f32.mrf.mxu2 }
 0x55f   : > { %v3163_v42 = vpop.eup %2269  ;;  %v548_v29 = vmul.f32 1.442695, %v518_v21 }
 0x560   : > { %578 = vadd.xlane.f32.xlu2 %v3163_v42 }
 0x561   : > { %2271 = vpow2.f32 %v548_v29  ;;  %v3198_v29 = vpop.f32.mrf.mxu3 }
 0x564   : > { %v503_v28 = vpop.xlane.xlu0 %502 }
 0x565   : > { %v519_v44 = vsub.f32 %v3059_v5, %v503_v28 }
 0x566   : > { %v3167_v45 = vpop.f32.mrf.mxu2 }
 0x567   : > { %v3169_v31 = vpop.eup %2271  ;;  %v550_v8 = vmul.f32 1.442695, %v519_v44 }
 0x568   : > { %580 = vadd.xlane.f32.xlu0 %v3169_v31 }
 0x569   : > { %2273 = vpow2.f32 %v550_v8 }
 0x56c   : > { %v553_v48 = vpop.xlane.xlu0 %552 }
 0x56d   : > { %2275 = vrcp.f32 %v553_v48 }
 0x56e   : > { %v3172_v12 = vpop.f32.mrf.mxu2 }
 0x56f   : > { %v3174_v34 = vpop.eup %2273 }
 0x570   : > { %582 = vadd.xlane.f32.xlu2 %v3174_v34 }
 0x573   : > { %v2276_v60 = vpop.eup %2275 }
 0x574   : > { %v555_v5 = vpop.xlane.xlu0 %554  ;;  %v3178_v11 = vmul.f32 %v2276_v60, %v3066_v40 }
 0x575   : > { %2277 = vrcp.f32 %v555_v5 }
 0x576   : > { %v3180_v17 = vpop.f32.mrf.mxu2  ;;  %656 = vst [vmem:[%s2887_s15] sm:$0xff] %v3178_v11 }
 0x577   : > { %1636 = vmax.xlane.f32.xlu0 %v3180_v17 }
 0x578   : > { %1618 = vmax.xlane.f32.xlu2 %v3115_v51 }
 0x57b   : > { %v2278_v36 = vpop.eup %2277 }
 0x57c   : > { %v557_v15 = vpop.xlane.xlu0 %556  ;;  %v3187_v50 = vmul.f32 %v2278_v36, %v3072_v3 }
 0x57d   : > { %2279 = vrcp.f32 %v557_v15 }
 0x57e   : > { %657 = vst [vmem:[%s2887_s15 + $0x8] sm:$0xff] %v3187_v50 }
 0x57f   : > { %1634 = vmax.xlane.f32.xlu0 %v3172_v12 }
 0x580   : > { %1612 = vmax.xlane.f32.xlu2 %v3092_v18 }
 0x583   : > { %v2280_v40 = vpop.eup %2279 }
 0x584   : > { %v559_v39 = vpop.xlane.xlu0 %558  ;;  %v3194_v21 = vmul.f32 %v2280_v40, %v3078_v7  ;;  %v3209_v7 = vpop.f32.mrf.mxu3 }
 0x585   : > { %2281 = vrcp.f32 %v559_v39 }
 0x586   : > { %658 = vst [vmem:[%s2887_s15 + $0x10] sm:$0xff] %v3194_v21 }
 0x587   : > { %1632 = vmax.xlane.f32.xlu0 %v3167_v45 }
 0x588   : > { %1230 = vmax.xlane.f32.xlu2 %v3089_v10 }
 0x58b   : > { %v2282_v3 = vpop.eup %2281 }
 0x58c   : > { %v561_v28 = vpop.xlane.xlu0 %560  ;;  %v3203_v44 = vmul.f32 %v2282_v3, %v3086_v4  ;;  %v3218_v5 = vpop.f32.mrf.mxu3 }
 0x58d   : > { %2283 = vrcp.f32 %v561_v28 }
 0x58e   : > { %659 = vst [vmem:[%s2887_s15 + $0x18] sm:$0xff] %v3203_v44 }
 0x58f   : > { %1630 = vmax.xlane.f32.xlu0 %v3161_v63 }
 0x590   : > { %1236 = vmax.xlane.f32.xlu2 %v3121_v58 }
 0x593   : > { %v2284_v8 = vpop.eup %2283 }
 0x594   : > { %v563_v48 = vpop.xlane.xlu0 %562  ;;  %v3212_v60 = vmul.f32 %v2284_v8, %v3094_v61  ;;  %v3230_v3 = vpop.f32.mrf.mxu3 }
 0x595   : > { %2285 = vrcp.f32 %v563_v48 }
 0x596   : > { %660 = vst [vmem:[%s2887_s15 + $0x20] sm:$0xff] %v3212_v60 }
 0x597   : > { %1628 = vmax.xlane.f32.xlu0 %v3155_v49 }
 0x598   : > { %1242 = vmax.xlane.f32.xlu2 %v3198_v29 }
 0x59b   : > { %v2286_v4 = vpop.eup %2285 }
 0x59c   : > { %v565_v36 = vpop.xlane.xlu0 %564  ;;  %v3221_v15 = vmul.f32 %v2286_v4, %v3102_v26 }
 0x59d   : > { %2287 = vrcp.f32 %v565_v36 }
 0x59e   : > { %661 = vst [vmem:[%s2887_s15 + $0x28] sm:$0xff] %v3221_v15 }
 0x59f   : > { %1626 = vmax.xlane.f32.xlu0 %v3149_v30 }
 0x5a0   : > { %1244 = vmax.xlane.f32.xlu2 %v3209_v7 }
 0x5a3   : > { %v2288_v61 = vpop.eup %2287  ;;  %v567_v40 = vpop.xlane.xlu2 %566 }
 0x5a4   : > { %2289 = vrcp.f32 %v567_v40  ;;  %v3228_v39 = vmul.f32 %v2288_v61, %v3110_v27  ;;  %v3241_v27 = vpop.f32.mrf.mxu3 }
 0x5a6   : > { %662 = vst [vmem:[%s2887_s15 + $0x30] sm:$0xff] %v3228_v39 }
 0x5a7   : > { %1624 = vmax.xlane.f32.xlu0 %v3142_v56 }
 0x5a8   : > { %1246 = vmax.xlane.f32.xlu2 %v3218_v5 }
 0x5aa   : > { %v2290_v26 = vpop.eup %2289 }
 0x5ab   : > { %v569_v28 = vpop.xlane.xlu0 %568  ;;  %v3237_v8 = vmul.f32 %v2290_v26, %v3117_v53 }
 0x5ac   : > { %2291 = vrcp.f32 %v569_v28  ;;  %v3252_v53 = vpop.f32.mrf.mxu3 }
 0x5ad   : > { %663 = vst [vmem:[%s2887_s15 + $0x38] sm:$0xff] %v3237_v8 }
 0x5af   : > { %1622 = vmax.xlane.f32.xlu0 %v3133_v55 }
 0x5b0   : > { %1248 = vmax.xlane.f32.xlu2 %v3230_v3 }
 0x5b2   : > { %v2292_v48 = vpop.eup %2291 }
 0x5b3   : > { %v571_v4 = vpop.xlane.xlu2 %570  ;;  %v3246_v36 = vmul.f32 %v2292_v48, %v3126_v54 }
 0x5b4   : > { %2293 = vrcp.f32 %v571_v4  ;;  %v3258_v28 = vpop.f32.mrf.mxu3 }
 0x5b5   : > { %664 = vst [vmem:[%s2887_s15 + $0x40] sm:$0xff] %v3246_v36 }
 0x5b7   : > { %1620 = vmax.xlane.f32.xlu0 %v3124_v1 }
 0x5b8   : > { %1250 = vmax.xlane.f32.xlu2 %v3241_v27 }
 0x5ba   : > { %v2294_v61 = vpop.eup %2293 }
 0x5bb   : > { %v573_v40 = vpop.xlane.xlu0 %572  ;;  %v609_v26 = vmul.f32 %v2294_v61, %v3135_v52 }
 0x5bc   : > { %2295 = vrcp.f32 %v573_v40  ;;  %v3265_v2 = vpop.f32.mrf.mxu3 }
 0x5bd   : > { %665 = vst [vmem:[%s2887_s15 + $0x48] sm:$0xff] %v609_v26 }
 0x5bf   : > { %1614 = vmax.xlane.f32.xlu0 %v3100_v20 }
 0x5c0   : > { %1252 = vmax.xlane.f32.xlu2 %v3252_v53 }
 0x5c2   : > { %v2296_v54 = vpop.eup %2295 }
 0x5c3   : > { %v575_v48 = vpop.xlane.xlu2 %574  ;;  %v610_v4 = vmul.f32 %v2296_v54, %v3144_v13 }
 0x5c4   : > { %2297 = vrcp.f32 %v575_v48  ;;  %v3271_v48 = vpop.f32.mrf.mxu3 }
 0x5c5   : > { %666 = vst [vmem:[%s2887_s15 + $0x50] sm:$0xff] %v610_v4 }
 0x5c7   : > { %1608 = vmax.xlane.f32.xlu0 %v3076_v6 }
 0x5c8   : > { %1254 = vmax.xlane.f32.xlu2 %v3258_v28 }
 0x5ca   : > { %v2298_v52 = vpop.eup %2297 }
 0x5cb   : > { %v577_v61 = vpop.xlane.xlu0 %576  ;;  %v611_v40 = vmul.f32 %v2298_v52, %v3151_v32 }
 0x5cc   : > { %2299 = vrcp.f32 %v577_v61 }
 0x5cd   : > { %667 = vst [vmem:[%s2887_s15 + $0x58] sm:$0xff] %v611_v40 }
 0x5d0   : > { %1256 = vmax.xlane.f32.xlu2 %v3265_v2 }
 0x5d2   : > { %v2300_v25 = vpop.eup %2299 }
 0x5d3   : > { %v579_v13 = vpop.xlane.xlu2 %578  ;;  %v612_v54 = vmul.f32 %v2300_v25, %v3157_v59 }
 0x5d4   : > { %2301 = vrcp.f32 %v579_v13 }
 0x5d5   : > { %668 = vst [vmem:[%s2887_s15 + $0x60] sm:$0xff] %v612_v54 }
 0x5d8   : > { %1258 = vmax.xlane.f32.xlu2 %v3271_v48 }
 0x5da   : > { %v2302_v23 = vpop.eup %2301 }
 0x5db   : > { %v581_v32 = vpop.xlane.xlu0 %580  ;;  %v613_v52 = vmul.f32 %v2302_v23, %v3163_v42 }
 0x5dc   : > { %2303 = vrcp.f32 %v581_v32 }
 0x5dd   : > { %669 = vst [vmem:[%s2887_s15 + $0x68] sm:$0xff] %v613_v52 }
 0x5e2   : > { %v2304_v61 = vpop.eup %2303 }
 0x5e3   : > { %v583_v35 = vpop.xlane.xlu2 %582  ;;  %v614_v33 = vmul.f32 %v2304_v61, %v3169_v31 }
 0x5e4   : > { %2305 = vrcp.f32 %v583_v35 }
 0x5e5   : > { %670 = vst [vmem:[%s2887_s15 + $0x70] sm:$0xff] %v614_v33 }
 0x5ea   : > { %v2306_v25 = vpop.eup %2305  ;;  %v1637_v59 = vpop.xlane.xlu0 %1636 }
 0x5eb   : > { %v1653_v13 = vsub.f32 %v3180_v17, %v1637_v59  ;;  %v3279_v22 = vpop.xlane.xlu2 %1618  ;;  %v615_v6 = vmul.f32 %v2306_v25, %v3174_v34  ;;  %v3289_v34 = vpop.xlane.xlu1 %1616 }
 0x5ed   : > { %v1684_v38 = vmul.f32 1.442695, %v1653_v13  ;;  %626 = vmatpush.msrb.mxu1 %v615_v6  ;;  %671 = vst [vmem:[%s2887_s15 + $0x78] sm:$0xff] %v615_v6 }
 0x5ef   : > { %2307 = vpow2.f32 %v1684_v38  ;;  %627 = vmatpush.msrb.mxu1 %v614_v33 }
 0x5f1   : > { %628 = vmatpush.msrb.mxu1 %v613_v52 }
 0x5f2   : > { %v1635_v23 = vpop.xlane.xlu0 %1634 }
 0x5f3   : > { %v1652_v42 = vsub.f32 %v3172_v12, %v1635_v23  ;;  %v3284_v31 = vpop.xlane.xlu2 %1612  ;;  %629 = vmatpush.msrb.mxu1 %v612_v54 }
 0x5f5   : > { %v3286_v35 = vpop.eup %2307  ;;  %v1682_v32 = vmul.f32 1.442695, %v1652_v42  ;;  %630 = vmatpush.msrb.mxu1 %v611_v40 }
 0x5f6   : > { %1716 = vadd.xlane.f32.xlu0 %v3286_v35 }
 0x5f7   : > { %2309 = vpow2.f32 %v1682_v32  ;;  %631 = vmatpush.msrb.mxu1 %v610_v4 }
 0x5f9   : > { %632 = vmatpush.msrb.mxu1 %v609_v26 }
 0x5fa   : > { %v1633_v38 = vpop.xlane.xlu0 %1632 }
 0x5fb   : > { %v1651_v33 = vsub.f32 %v3167_v45, %v1633_v38  ;;  %v3292_v6 = vpop.xlane.xlu2 %1230  ;;  %633 = vmatpush.msrb.mxu1 %v3246_v36  ;;  %v316_v45 = vadd.f32 %v2786_v41, %v2818_v62  ;;  %v3307_v36 = vpop.xlane.xlu1 %1610  ;;  %v619_v41 = vrot.slane %v2751_v16, 4 }
 0x5fd   : > { %v3295_v12 = vpop.eup %2309  ;;  %v1680_v17 = vmul.f32 1.442695, %v1651_v33  ;;  %634 = vmatpush.msrb.mxu1 %v3237_v8 }
 0x5fe   : > { %1228 = vmax.xlane.f32.xlu0 %v3080_v9  ;;  %1714 = vadd.xlane.f32.xlu2 %v3295_v12 }
 0x5ff   : > { %2311 = vpow2.f32 %v1680_v17  ;;  %635 = vmatpush.msrb.mxu1 %v3228_v39  ;;  %v1644_v17 = vsub.f32 %v3115_v51, %v3279_v22 }
 0x601   : > { %636 = vmatpush.msrb.mxu1 %v3221_v15  ;;  %v620_v15 = vrot.slane %v316_v45, 4  ;;  %v1666_v45 = vmul.f32 1.442695, %v1644_v17 }
 0x602   : > { %v1631_v26 = vpop.xlane.xlu0 %1630 }
 0x603   : > { %v3304_v4 = vpop.xlane.xlu2 %1236  ;;  %637 = vmatpush.msrb.mxu1 %v3212_v60  ;;  %v1650_v40 = vsub.f32 %v3161_v63, %v1631_v26  ;;  %v621_v63 = vsel %vm618_vm3, %v619_v41, %v620_v15  ;;  %v3323_v25 = vpop.xlane.xlu1 %1606 }
 0x605   : > { %v3309_v8 = vpop.eup %2311  ;;  %638 = vmatpush.msrb.mxu1 %v3203_v44  ;;  %v1678_v60 = vmul.f32 1.442695, %v1650_v40  ;;  %v319_v44 = vadd.f32 %v2789_v43, %v2853_v46 }
 0x606   : > { %1232 = vmax.xlane.f32.xlu0 %v3097_v24  ;;  %1712 = vadd.xlane.f32.xlu1 %v3309_v8 }
 0x607   : > { %639 = vmatpush.msrb.mxu1 %v3194_v21  ;;  %2313 = vpow2.f32 %v1678_v60  ;;  %v622_v16 = vrot.slane %v319_v44, 4 }
 0x609   : > { %640 = vmatpush.msrb.mxu1 %v3187_v50 }
 0x60a   : > { %v1629_v39 = vpop.xlane.xlu0 %1628 }
 0x60b   : > { %v1649_v54 = vsub.f32 %v3155_v49, %v1629_v39  ;;  %v1243_v52 = vpop.xlane.xlu2 %1242  ;;  %641 = vmatpush.msrb.mxu1 %v3178_v11  ;;  %v623_v11 = vsel %vm618_vm3, %v620_v15, %v622_v16  ;;  %v3334_v23 = vpop.xlane.xlu1 %1234 }
 0x60c   : > { %642 = vmatmul.f32.vlgmr.msrb.gmra.mxu1 %v621_v63 }
 0x60d   : > { %v1676_v61 = vmul.f32 1.442695, %v1649_v54  ;;  %v3328_v59 = vpop.eup %2313  ;;  %v1267_v54 = vsub.f32 %v3198_v29, %v1243_v52 }
 0x60e   : > { %1238 = vmax.xlane.f32.xlu0 %v3130_v14 }
 0x60f   : > { %2315 = vpow2.f32 %v1676_v61  ;;  %v1290_v51 = vmul.f32 1.442695, %v1267_v54 }
 0x612   : > { %v1627_v50 = vpop.xlane.xlu0 %1626 }
 0x613   : > { %v1648_v49 = vsub.f32 %v3149_v30, %v1627_v50  ;;  %v1245_v21 = vpop.xlane.xlu2 %1244  ;;  %v1241_v26 = vpop.xlane.xlu1 %1240 }
 0x614   : > { %645 = vmatmul.f32.gmra.mxu1 %v623_v11  ;;  %v1268_v52 = vsub.f32 %v3209_v7, %v1245_v21 }
 0x615   : > { %v3330_v13 = vpop.eup %2315  ;;  %v1674_v43 = vmul.f32 1.442695, %v1648_v49 }
 0x616   : > { %1710 = vadd.xlane.f32.xlu0 %v3328_v59  ;;  %1708 = vadd.xlane.f32.xlu2 %v3330_v13 }
 0x617   : > { %2317 = vpow2.f32 %v1674_v43 }
 0x61a   : > { %v1625_v42 = vpop.xlane.xlu0 %1624 }
 0x61b   : > { %v1647_v32 = vsub.f32 %v3142_v56, %v1625_v42  ;;  %v1247_v30 = vpop.xlane.xlu2 %1246  ;;  %v1266_v56 = vsub.f32 %v3139_v0, %v1241_v26 }
 0x61c   : > { %v1269_v0 = vsub.f32 %v3218_v5, %v1247_v30 }
 0x61d   : > { %v3337_v38 = vpop.eup %2317  ;;  %v1672_v33 = vmul.f32 1.442695, %v1647_v32  ;;  %v1288_v22 = vmul.f32 1.442695, %v1266_v56  ;;  %v1292_v32 = vmul.f32 1.442695, %v1268_v52  ;;  %v1638_v52 = vsub.f32 %v3070_v19, %v3323_v25 }
 0x61e   : > { %1706 = vadd.xlane.f32.xlu1 %v3337_v38  ;;  %v1640_v19 = vsub.f32 %v3084_v57, %v3307_v36 }
 0x61f   : > { %2319 = vpow2.f32 %v1672_v33 }
 0x620   : > { %2321 = vpow2.f32 %v1666_v45 }
 0x622   : > { %v1623_v40 = vpop.xlane.xlu0 %1622 }
 0x623   : > { %v1646_v15 = vsub.f32 %v3133_v55, %v1623_v40  ;;  %v1249_v41 = vpop.xlane.xlu2 %1248 }
 0x624   : > { %v1270_v29 = vsub.f32 %v3230_v3, %v1249_v41 }
 0x625   : > { %v3343_v60 = vpop.eup %2319  ;;  %v1670_v39 = vmul.f32 1.442695, %v1646_v15 }
 0x626   : > { %1704 = vadd.xlane.f32.xlu0 %v3343_v60  ;;  %v3349_v16 = vpop.eup %2321  ;;  %v1296_v11 = vmul.f32 1.442695, %v1270_v29 }
 0x627   : > { %2323 = vpow2.f32 %v1670_v39 }
 0x628   : > { %2325 = vpow2.f32 %v1288_v22 }
 0x629   : > { %2327 = vpow2.f32 %v1290_v51 }
 0x62a   : > { %v1621_v63 = vpop.xlane.xlu0 %1620 }
 0x62b   : > { %v1645_v44 = vsub.f32 %v3124_v1, %v1621_v63  ;;  %v1251_v61 = vpop.xlane.xlu2 %1250  ;;  %v1294_v1 = vmul.f32 1.442695, %v1269_v0 }
 0x62c   : > { %v1271_v5 = vsub.f32 %v3241_v27, %v1251_v61 }
 0x62d   : > { %v3351_v55 = vpop.eup %2323  ;;  %v1668_v50 = vmul.f32 1.442695, %v1645_v44 }
 0x62e   : > { %1698 = vadd.xlane.f32.xlu0 %v3349_v16  ;;  %1702 = vadd.xlane.f32.xlu2 %v3351_v55  ;;  %v3358_v49 = vpop.eup %2325  ;;  %v1298_v3 = vmul.f32 1.442695, %v1271_v5 }
 0x62f   : > { %2329 = vpow2.f32 %v1668_v50  ;;  %v3360_v42 = vpop.eup %2327  ;;  %v1643_v50 = vsub.f32 %v3106_v37, %v3289_v34  ;;  %v1263_v34 = vsub.f32 %v3108_v47, %v3334_v23 }
 0x630   : > { %2331 = vpow2.f32 %v1294_v1 }
 0x631   : > { %2333 = vpow2.f32 %v1296_v11 }
 0x632   : > { %2335 = vpow2.f32 %v1292_v32  ;;  %v1615_v37 = vpop.xlane.xlu0 %1614 }
 0x633   : > { %v1253_v43 = vpop.xlane.xlu2 %1252  ;;  %2337 = vpow2.f32 %v1298_v3 }
 0x634   : > { %v1272_v7 = vsub.f32 %v3252_v53, %v1253_v43  ;;  %v1264_v53 = vsub.f32 %v3121_v58, %v3304_v4  ;;  %v1641_v58 = vsub.f32 %v3092_v18, %v3284_v31  ;;  %v1261_v18 = vsub.f32 %v3089_v10, %v3292_v6 }
 0x635   : > { %v3362_v33 = vpop.eup %2329  ;;  %v1664_v31 = vmul.f32 1.442695, %v1643_v50  ;;  %v1654_v10 = vmul.f32 1.442695, %v1638_v52  ;;  %v1282_v6 = vmul.f32 1.442695, %v1263_v34 }
 0x636   : > { %1322 = vadd.xlane.f32.xlu0 %v3360_v42  ;;  %1320 = vadd.xlane.f32.xlu2 %v3358_v49  ;;  %v1300_v21 = vmul.f32 1.442695, %v1272_v7  ;;  %v3369_v17 = vpop.eup %2331  ;;  %v1284_v15 = vmul.f32 1.442695, %v1264_v53  ;;  %v1660_v4 = vmul.f32 1.442695, %v1641_v58 }
 0x637   : > { %1700 = vadd.xlane.f32.xlu1 %v3362_v33  ;;  %v3372_v45 = vpop.eup %2333  ;;  %v1278_v0 = vmul.f32 1.442695, %v1261_v18  ;;  %v1658_v43 = vmul.f32 1.442695, %v1640_v19 }
 0x638   : > { %v3374_v27 = vpop.eup %2335  ;;  %2339 = vpow2.f32 %v1300_v21 }
 0x63a   : > { %v3422_v25 = vpop.xlane.xlu0 %1608 }
 0x63b   : > { %v1255_v30 = vpop.xlane.xlu2 %1254 }
 0x63c   : > { %v1273_v26 = vsub.f32 %v3258_v28, %v1255_v30  ;;  %v3381_v28 = vpop.eup %2337 }
 0x63e   : > { %v1302_v40 = vmul.f32 1.442695, %v1273_v26  ;;  %1328 = vadd.xlane.f32.xlu0 %v3372_v45  ;;  %1326 = vadd.xlane.f32.xlu2 %v3369_v17  ;;  %v3384_v39 = vpop.eup %2339 }
 0x63f   : > { %1324 = vadd.xlane.f32.xlu1 %v3374_v27 }
 0x640   : > { %2341 = vpow2.f32 %v1302_v40 }
 0x641   : > { %2343 = vpow2.f32 %v1284_v15 }
 0x643   : > { %v1257_v41 = vpop.xlane.xlu2 %1256 }
 0x644   : > { %v1274_v56 = vsub.f32 %v3265_v2, %v1257_v41 }
 0x646   : > { %v3386_v54 = vpop.eup %2341  ;;  %v1304_v22 = vmul.f32 1.442695, %v1274_v56  ;;  %1332 = vadd.xlane.f32.xlu2 %v3384_v39 }
 0x647   : > { %1330 = vadd.xlane.f32.xlu1 %v3381_v28  ;;  %1334 = vadd.xlane.f32.xlu0 %v3386_v54  ;;  %v3394_v63 = vpop.eup %2343 }
 0x648   : > { %2345 = vpow2.f32 %v1304_v22 }
 0x649   : > { %2347 = vpow2.f32 %v1660_v4 }
 0x64b   : > { %v1259_v51 = vpop.xlane.xlu2 %1258 }
 0x64c   : > { %v1275_v2 = vsub.f32 %v3271_v48, %v1259_v51 }
 0x64e   : > { %v3396_v44 = vpop.eup %2345  ;;  %v1306_v61 = vmul.f32 1.442695, %v1275_v2 }
 0x64f   : > { %1316 = vadd.xlane.f32.xlu0 %v3394_v63  ;;  %1336 = vadd.xlane.f32.xlu1 %v3396_v44  ;;  %v3404_v48 = vpop.eup %2347 }
 0x650   : > { %2349 = vpow2.f32 %v1306_v61  ;;  %v3640_v61 = vld [vmem:[#allocation16_spill] sm:$0xff] }
 0x651   : > { %2351 = vpow2.f32 %v1664_v31 }
 0x652   : > { %2353 = vpow2.f32 %v1278_v0 }
 0x653   : > { %2355 = vpow2.f32 %v1654_v10 }
 0x654   : > { %2357 = vpow2.f32 %v1282_v6 }
 0x655   : > { %2359 = vpow2.f32 %v1658_v43 }
 0x656   : > { %v3406_v29 = vpop.eup %2349 }
 0x657   : > { %1692 = vadd.xlane.f32.xlu0 %v3404_v48  ;;  %1338 = vadd.xlane.f32.xlu2 %v3406_v29  ;;  %v3414_v1 = vpop.eup %2351 }
 0x658   : > { %v3416_v11 = vpop.eup %2353 }
 0x659   : > { %v3424_v47 = vpop.eup %2355 }
 0x65a   : > { %v3426_v23 = vpop.eup %2357 }
 0x65b   : > { %v3430_v5 = vpop.eup %2359 }
 0x65f   : > { %1310 = vadd.xlane.f32.xlu0 %v3416_v11  ;;  %1696 = vadd.xlane.f32.xlu2 %v3414_v1 }
 0x667   : > { %1686 = vadd.xlane.f32.xlu0 %v3424_v47  ;;  %1314 = vadd.xlane.f32.xlu2 %v3426_v23 }
 0x669   : > { %v1717_v32 = vpop.xlane.xlu0 %1716 }
 0x66a   : > { %2361 = vrcp.f32 %v1717_v32 }
 0x66f   : > { %1690 = vadd.xlane.f32.xlu2 %v3430_v5 }
 0x670   : > { %v2362_v57 = vpop.eup %2361 }
 0x671   : > { %v1715_v36 = vpop.xlane.xlu2 %1714  ;;  %v1229_v7 = vpop.xlane.xlu0 %1228  ;;  %v1749_v3 = vmul.f32 %v2362_v57, %v3286_v35 }
 0x672   : > { %2363 = vrcp.f32 %v1715_v36  ;;  %v1260_v21 = vsub.f32 %v3080_v9, %v1229_v7  ;;  %v3641_v36 = vld [vmem:[#allocation19_spill] sm:$0xff] }
 0x673   : > { %1759 = vmatpush.msra.mxu1 %v1749_v3  ;;  %2102 = vst [vmem:[%s2887_s15 + $0x1f8] sm:$0xff] %v1749_v3  ;;  %v1639_v7 = vsub.f32 %v3641_v36, %v3422_v25 }
 0x674   : > { %v1276_v30 = vmul.f32 1.442695, %v1260_v21 }
 0x675   : > { %v1656_v21 = vmul.f32 1.442695, %v1639_v7 }
 0x676   : > { %2365 = vpow2.f32 %v1276_v30 }
 0x678   : > { %v2364_v26 = vpop.eup %2363 }
 0x679   : > { %v1713_v40 = vpop.xlane.xlu1 %1712  ;;  %v1233_v53 = vpop.xlane.xlu0 %1232  ;;  %v1748_v15 = vmul.f32 %v2364_v26, %v3295_v12  ;;  %v1642_v12 = vsub.f32 %v3100_v20, %v1615_v37 }
 0x67a   : > { %2367 = vrcp.f32 %v1713_v40  ;;  %v1262_v20 = vsub.f32 %v3097_v24, %v1233_v53  ;;  %v2436_v24 = vld [vmem:[%s2701_s19 + $0x8] sm:$0xff] }
 0x67b   : > { %1760 = vmatpush.msra.mxu1 %v1748_v15  ;;  %2101 = vst [vmem:[%s2887_s15 + $0x1f0] sm:$0xff] %v1748_v15  ;;  %v1662_v2 = vmul.f32 1.442695, %v1642_v12 }
 0x67c   : > { %v3438_v41 = vpop.eup %2365  ;;  %v1280_v6 = vmul.f32 1.442695, %v1262_v20 }
 0x67d   : > { %1308 = vadd.xlane.f32.xlu2 %v3438_v41 }
 0x680   : > { %v2368_v35 = vpop.eup %2367 }
 0x681   : > { %v1239_v56 = vpop.xlane.xlu0 %1238  ;;  %v1747_v9 = vmul.f32 %v2368_v35, %v3309_v8  ;;  %v2435_v8 = vld [vmem:[%s2701_s19] sm:$0xff] }
 0x682   : > { %v1265_v22 = vsub.f32 %v3130_v14, %v1239_v56 }
 0x683   : > { %1761 = vmatpush.msra.mxu1 %v1747_v9  ;;  %2100 = vst [vmem:[%s2887_s15 + $0x1e8] sm:$0xff] %v1747_v9 }
 0x684   : > { %v1286_v58 = vmul.f32 1.442695, %v1265_v22 }
 0x686   : > { %2369 = vpow2.f32 %v1286_v58 }
 0x689   : > { %v643_v4 = vpop.f32.mrf.mxu1  ;;  %v1709_v51 = vpop.xlane.xlu2 %1708 }
 0x68a   : > { %v650_v50 = vmul.f32 %v3640_v61, %v643_v4  ;;  %2371 = vrcp.f32 %v1709_v51  ;;  %v1711_v18 = vpop.xlane.xlu0 %1710 }
 0x68b   : > { %2373 = vrcp.f32 %v1711_v18 }
 0x68c   : > { %v3446_v31 = vpop.eup %2369  ;;  %v652_v14 = vadd.f32 %v2435_v8, %v650_v50  ;;  %2375 = vpow2.f32 %v1662_v2 }
 0x68d   : > { %1318 = vadd.xlane.f32.xlu1 %v3446_v31 }
 0x68e   : > { %654 = vst [vmem:[%s2967_s14] sm:$0xff] %v652_v14 }
 0x690   : > { %v2372_v0 = vpop.eup %2371 }
 0x691   : > { %v2374_v52 = vpop.eup %2373  ;;  %v646_v37 = vpop.f32.mrf.mxu1  ;;  %v1745_v10 = vmul.f32 %v2372_v0, %v3330_v13 }
 0x692   : > { %v1707_v34 = vpop.xlane.xlu1 %1706  ;;  %v651_v19 = vmul.f32 %v3640_v61, %v646_v37  ;;  %v1746_v43 = vmul.f32 %v2374_v52, %v3328_v59  ;;  %v3456_v32 = vpop.eup %2375 }
 0x693   : > { %2377 = vrcp.f32 %v1707_v34  ;;  %2098 = vst [vmem:[%s2887_s15 + $0x1d8] sm:$0xff] %v1745_v10 }
 0x694   : > { %v653_v57 = vadd.f32 %v2436_v24, %v651_v19  ;;  %1762 = vmatpush.msra.mxu1 %v1746_v43  ;;  %2099 = vst [vmem:[%s2887_s15 + $0x1e0] sm:$0xff] %v1746_v43  ;;  %2379 = vpow2.f32 %v1280_v6 }
 0x695   : > { %1694 = vadd.xlane.f32.xlu1 %v3456_v32 }
 0x696   : > { %655 = vst [vmem:[%s2967_s14 + $0x8] sm:$0xff] %v653_v57  ;;  %1763 = vmatpush.msra.mxu1 %v1745_v10 }
 0x699   : > { %v2378_v13 = vpop.eup %2377  ;;  %v1705_v3 = vpop.xlane.xlu0 %1704 }
 0x69a   : > { %v1744_v59 = vmul.f32 %v2378_v13, %v3337_v38  ;;  %2381 = vrcp.f32 %v1705_v3  ;;  %v3466_v30 = vpop.eup %2379 }
 0x69b   : > { %2383 = vpow2.f32 %v1656_v21 }
 0x69c   : > { %1764 = vmatpush.msra.mxu1 %v1744_v59  ;;  %2097 = vst [vmem:[%s2887_s15 + $0x1d0] sm:$0xff] %v1744_v59 }
 0x69d   : > { %1312 = vadd.xlane.f32.xlu1 %v3466_v30 }
 0x6a0   : > { %v2382_v26 = vpop.eup %2381 }
 0x6a1   : > { %v1703_v40 = vpop.xlane.xlu2 %1702  ;;  %v1699_v25 = vpop.xlane.xlu0 %1698  ;;  %v1743_v53 = vmul.f32 %v2382_v26, %v3343_v60 }
 0x6a2   : > { %2385 = vrcp.f32 %v1703_v40  ;;  %v3471_v38 = vpop.eup %2383 }
 0x6a3   : > { %2387 = vrcp.f32 %v1699_v25  ;;  %1765 = vmatpush.msra.mxu1 %v1743_v53  ;;  %2096 = vst [vmem:[%s2887_s15 + $0x1c8] sm:$0xff] %v1743_v53 }
 0x6a5   : > { %1688 = vadd.xlane.f32.xlu1 %v3471_v38 }
 0x6a8   : > { %v2386_v15 = vpop.eup %2385 }
 0x6a9   : > { %v2388_v35 = vpop.eup %2387  ;;  %v1321_v56 = vpop.xlane.xlu2 %1320  ;;  %v1742_v22 = vmul.f32 %v2386_v15, %v3351_v55 }
 0x6aa   : > { %v1323_v9 = vpop.xlane.xlu0 %1322  ;;  %2389 = vrcp.f32 %v1321_v56  ;;  %v1701_v58 = vpop.xlane.xlu1 %1700  ;;  %v1740_v60 = vmul.f32 %v2388_v35, %v3349_v16 }
 0x6ab   : > { %2391 = vrcp.f32 %v1701_v58  ;;  %1766 = vmatpush.msra.mxu1 %v1742_v22  ;;  %2095 = vst [vmem:[%s2887_s15 + $0x1c0] sm:$0xff] %v1742_v22 }
 0x6ac   : > { %2393 = vrcp.f32 %v1323_v9  ;;  %2093 = vst [vmem:[%s2887_s15 + $0x1b0] sm:$0xff] %v1740_v60 }
 0x6b0   : > { %v2390_v12 = vpop.eup %2389 }
 0x6b1   : > { %v2392_v4 = vpop.eup %2391  ;;  %v1327_v51 = vpop.xlane.xlu2 %1326  ;;  %v3479_v50 = vmul.f32 %v2390_v12, %v3358_v49 }
 0x6b2   : > { %v1329_v2 = vpop.xlane.xlu0 %1328  ;;  %v2394_v55 = vpop.eup %2393  ;;  %2395 = vrcp.f32 %v1327_v51  ;;  %v1741_v16 = vmul.f32 %v2392_v4, %v3362_v33 }
 0x6b3   : > { %v1325_v18 = vpop.xlane.xlu1 %1324  ;;  %v3483_v8 = vmul.f32 %v2394_v55, %v3360_v42  ;;  %2053 = vst [vmem:[%s2887_s15 + $0x130] sm:$0xff] %v3479_v50 }
 0x6b4   : > { %2397 = vrcp.f32 %v1325_v18  ;;  %1767 = vmatpush.msra.mxu1 %v1741_v16  ;;  %2094 = vst [vmem:[%s2887_s15 + $0x1b8] sm:$0xff] %v1741_v16 }
 0x6b5   : > { %2399 = vrcp.f32 %v1329_v2  ;;  %2054 = vst [vmem:[%s2887_s15 + $0x138] sm:$0xff] %v3483_v8 }
 0x6b6   : > { %1768 = vmatpush.msra.mxu1 %v1740_v60 }
 0x6b8   : > { %v2396_v49 = vpop.eup %2395 }
 0x6b9   : > { %v1333_v20 = vpop.xlane.xlu2 %1332  ;;  %v1365_v33 = vmul.f32 %v2396_v49, %v3369_v17  ;;  %v3643_v49 = vld [vmem:[#allocation15_spill] sm:$0xff] }
 0x6ba   : > { %v2398_v14 = vpop.eup %2397  ;;  %2401 = vrcp.f32 %v1333_v20  ;;  %v1335_v52 = vpop.xlane.xlu0 %1334 }
 0x6bb   : > { %v2400_v0 = vpop.eup %2399  ;;  %v1331_v42 = vpop.xlane.xlu1 %1330  ;;  %v1364_v37 = vmul.f32 %v2398_v14, %v3374_v27  ;;  %2056 = vst [vmem:[%s2887_s15 + $0x148] sm:$0xff] %v1365_v33  ;;  %v1374_v14 = vrot.slane %v3643_v49, 4 }
 0x6bc   : > { %2403 = vrcp.f32 %v1331_v42  ;;  %v1366_v34 = vmul.f32 %v2400_v0, %v3372_v45  ;;  %v3645_v0 = vld [vmem:[#allocation13_spill] sm:$0xff] }
 0x6bd   : > { %2405 = vrcp.f32 %v1335_v52  ;;  %2055 = vst [vmem:[%s2887_s15 + $0x140] sm:$0xff] %v1364_v37  ;;  %v1077_v42 = vadd.f32 %v3645_v0, %v2853_v46 }
 0x6be   : > { %2057 = vst [vmem:[%s2887_s15 + $0x150] sm:$0xff] %v1366_v34 }
 0x6c0   : > { %v2402_v10 = vpop.eup %2401 }
 0x6c1   : > { %v1368_v17 = vmul.f32 %v2402_v10, %v3384_v39 }
 0x6c2   : > { %v2404_v6 = vpop.eup %2403  ;;  %v1317_v24 = vpop.xlane.xlu0 %1316 }
 0x6c3   : > { %v2406_v19 = vpop.eup %2405  ;;  %v1337_v43 = vpop.xlane.xlu1 %1336  ;;  %v1367_v27 = vmul.f32 %v2404_v6, %v3381_v28  ;;  %2059 = vst [vmem:[%s2887_s15 + $0x160] sm:$0xff] %v1368_v17  ;;  %v1377_v6 = vrot.slane %v1077_v42, 4 }
 0x6c4   : > { %2407 = vrcp.f32 %v1337_v43  ;;  %v1369_v45 = vmul.f32 %v2406_v19, %v3386_v54 }
 0x6c5   : > { %2409 = vrcp.f32 %v1317_v24  ;;  %2058 = vst [vmem:[%s2887_s15 + $0x158] sm:$0xff] %v1367_v27 }
 0x6c6   : > { %2060 = vst [vmem:[%s2887_s15 + $0x168] sm:$0xff] %v1369_v45 }
 0x6ca   : > { %v2408_v57 = vpop.eup %2407  ;;  %v1339_v7 = vpop.xlane.xlu2 %1338 }
 0x6cb   : > { %v2410_v36 = vpop.eup %2409  ;;  %v1693_v13 = vpop.xlane.xlu0 %1692  ;;  %v1370_v39 = vmul.f32 %v2408_v57, %v3396_v44  ;;  %2411 = vrcp.f32 %v1339_v7 }
 0x6cc   : > { %v1360_v3 = vmul.f32 %v2410_v36, %v3394_v63  ;;  %2413 = vrcp.f32 %v1693_v13 }
 0x6cd   : > { %2061 = vst [vmem:[%s2887_s15 + $0x170] sm:$0xff] %v1370_v39 }
 0x6ce   : > { %2051 = vst [vmem:[%s2887_s15 + $0x120] sm:$0xff] %v1360_v3 }
 0x6d1   : > { %v2412_v28 = vpop.eup %2411 }
 0x6d2   : > { %v2414_v54 = vpop.eup %2413  ;;  %v1697_v59 = vpop.xlane.xlu2 %1696  ;;  %v1371_v26 = vmul.f32 %v2412_v28, %v3406_v29 }
 0x6d3   : > { %v1311_v21 = vpop.xlane.xlu0 %1310  ;;  %2415 = vrcp.f32 %v1697_v59  ;;  %v1737_v40 = vmul.f32 %v2414_v54, %v3404_v48 }
 0x6d4   : > { %2417 = vrcp.f32 %v1311_v21  ;;  %1381 = vmatpush.msra.mxu0 %v1371_v26  ;;  %2062 = vst [vmem:[%s2887_s15 + $0x178] sm:$0xff] %v1371_v26 }
 0x6d5   : > { %2090 = vst [vmem:[%s2887_s15 + $0x198] sm:$0xff] %v1737_v40 }
 0x6d6   : > { %1382 = vmatpush.msra.mxu0 %v1370_v39 }
 0x6d8   : > { %1383 = vmatpush.msra.mxu0 %v1369_v45 }
 0x6d9   : > { %v2416_v63 = vpop.eup %2415 }
 0x6da   : > { %v2418_v44 = vpop.eup %2417  ;;  %v1315_v25 = vpop.xlane.xlu2 %1314  ;;  %1384 = vmatpush.msra.mxu0 %v1368_v17  ;;  %v1739_v15 = vmul.f32 %v2416_v63, %v3414_v1  ;;  %v3647_v17 = vld [vmem:[#allocation18_spill] sm:$0xff] }
 0x6db   : > { %v1687_v53 = vpop.xlane.xlu0 %1686  ;;  %2419 = vrcp.f32 %v1315_v25  ;;  %v1357_v29 = vmul.f32 %v2418_v44, %v3416_v11  ;;  %v1455_v19 = vadd.f32 %v3647_v17, %v2853_v46 }
 0x6dc   : > { %2421 = vrcp.f32 %v1687_v53  ;;  %1385 = vmatpush.msra.mxu0 %v1367_v27  ;;  %1769 = vmatpush.msra.mxu1 %v1739_v15  ;;  %2092 = vst [vmem:[%s2887_s15 + $0x1a8] sm:$0xff] %v1739_v15 }
 0x6dd   : > { %2048 = vst [vmem:[%s2887_s15 + $0x108] sm:$0xff] %v1357_v29  ;;  %v1755_v24 = vrot.slane %v1455_v19, 4 }
 0x6de   : > { %1386 = vmatpush.msra.mxu0 %v1366_v34  ;;  %v3646_v34 = vld [vmem:[#allocation14_spill] sm:$0xff] }
 0x6df   : > { %v1752_v10 = vrot.slane %v3646_v34, 4 }
 0x6e0   : > { %1387 = vmatpush.msra.mxu0 %v1365_v33 }
 0x6e1   : > { %v2420_v48 = vpop.eup %2419 }
 0x6e2   : > { %v2422_v35 = vpop.eup %2421  ;;  %v1691_v56 = vpop.xlane.xlu2 %1690  ;;  %1388 = vmatpush.msra.mxu0 %v1364_v37  ;;  %v1359_v1 = vmul.f32 %v2420_v48, %v3426_v23 }
 0x6e3   : > { %2423 = vrcp.f32 %v1691_v56  ;;  %v1734_v11 = vmul.f32 %v2422_v35, %v3424_v47 }
 0x6e4   : > { %1389 = vmatpush.msra.mxu0 %v3483_v8  ;;  %2050 = vst [vmem:[%s2887_s15 + $0x118] sm:$0xff] %v1359_v1 }
 0x6e5   : > { %2087 = vst [vmem:[%s2887_s15 + $0x180] sm:$0xff] %v1734_v11 }
 0x6e6   : > { %1390 = vmatpush.msra.mxu0 %v3479_v50 }
 0x6e9   : > { %v2424_v9 = vpop.eup %2423 }
 0x6ea   : > { %v1736_v22 = vmul.f32 %v2424_v9, %v3430_v5 }
 0x6ec   : > { %2089 = vst [vmem:[%s2887_s15 + $0x190] sm:$0xff] %v1736_v22 }
 0x6f0   : > { %v1309_v58 = vpop.xlane.xlu2 %1308 }
 0x6f1   : > { %2425 = vrcp.f32 %v1309_v58 }
 0x6f7   : > { %v2426_v60 = vpop.eup %2425 }
 0x6f8   : > { %v1356_v12 = vmul.f32 %v2426_v60, %v3438_v41  ;;  %v3642_v41 = vld [vmem:[#allocation12_spill] sm:$0xff] }
 0x6f9   : > { %v1074_v55 = vadd.f32 %v3642_v41, %v2818_v62 }
 0x6fa   : > { %2047 = vst [vmem:[%s2887_s15 + $0x100] sm:$0xff] %v1356_v12 }
 0x6fb   : > { %v1375_v8 = vrot.slane %v1074_v55, 4 }
 0x6fd   : > { %v1376_v33 = vsel %vm618_vm3, %v1374_v14, %v1375_v8  ;;  %v1378_v43 = vsel %vm618_vm3, %v1375_v8, %v1377_v6 }
 0x700   : > { %v1319_v23 = vpop.xlane.xlu1 %1318 }
 0x701   : > { %2427 = vrcp.f32 %v1319_v23 }
 0x707   : > { %v2428_v47 = vpop.eup %2427 }
 0x708   : > { %v1695_v4 = vpop.xlane.xlu1 %1694  ;;  %v1361_v51 = vmul.f32 %v2428_v47, %v3446_v31 }
 0x709   : > { %2429 = vrcp.f32 %v1695_v4 }
 0x70a   : > { %1391 = vmatpush.msra.mxu0 %v1361_v51  ;;  %2052 = vst [vmem:[%s2887_s15 + $0x128] sm:$0xff] %v1361_v51 }
 0x70c   : > { %1392 = vmatpush.msra.mxu0 %v1360_v3 }
 0x70e   : > { %1393 = vmatpush.msra.mxu0 %v1359_v1 }
 0x70f   : > { %v2430_v5 = vpop.eup %2429 }
 0x710   : > { %v1313_v2 = vpop.xlane.xlu1 %1312  ;;  %v1738_v50 = vmul.f32 %v2430_v5, %v3456_v32  ;;  %v3644_v32 = vld [vmem:[#allocation17_spill] sm:$0xff] }
 0x711   : > { %2431 = vrcp.f32 %v1313_v2  ;;  %v1452_v20 = vadd.f32 %v3644_v32, %v2818_v62 }
 0x712   : > { %1770 = vmatpush.msra.mxu1 %v1738_v50  ;;  %2091 = vst [vmem:[%s2887_s15 + $0x1a0] sm:$0xff] %v1738_v50 }
 0x714   : > { %1771 = vmatpush.msra.mxu1 %v1737_v40 }
 0x716   : > { %1772 = vmatpush.msra.mxu1 %v1736_v22 }
 0x717   : > { %v2432_v18 = vpop.eup %2431 }
 0x718   : > { %v1689_v31 = vpop.xlane.xlu1 %1688  ;;  %v1358_v16 = vmul.f32 %v2432_v18, %v3466_v30  ;;  %v1753_v30 = vrot.slane %v1452_v20, 4 }
 0x719   : > { %2433 = vrcp.f32 %v1689_v31 }
 0x71a   : > { %1394 = vmatpush.msra.mxu0 %v1358_v16  ;;  %2049 = vst [vmem:[%s2887_s15 + $0x110] sm:$0xff] %v1358_v16  ;;  %v1754_v62 = vsel %vm618_vm3, %v1752_v10, %v1753_v30 }
 0x71c   : > { %1395 = vmatpush.msra.mxu0 %v1357_v29 }
 0x71e   : > { %1396 = vmatpush.msra.mxu0 %v1356_v12 }
 0x71f   : > { %v2434_v52 = vpop.eup %2433  ;;  %1397 = vmatmul.f32.vlgmr.msra.gmra.mxu0 %v1376_v33 }
 0x720   : > { %v1735_v37 = vmul.f32 %v2434_v52, %v3471_v38  ;;  %v1756_v38 = vsel %vm618_vm3, %v1753_v30, %v1755_v24 }
 0x722   : > { %1773 = vmatpush.msra.mxu1 %v1735_v37  ;;  %2088 = vst [vmem:[%s2887_s15 + $0x188] sm:$0xff] %v1735_v37 }
 0x724   : > { %1774 = vmatpush.msra.mxu1 %v1734_v11 }
 0x725   : > { %1775 = vmatmul.f32.vlgmr.msra.gmra.mxu1 %v1754_v62 }
 0x727   : > { %1400 = vmatmul.f32.gmra.mxu0 %v1378_v43 }
 0x72d   : > { %1778 = vmatmul.f32.gmra.mxu1 %v1756_v38 }
 0x72e   : > { %2498 = shalt.err (!%p2495_p4)
}
 0x72f   : > { %s2574_s15 = smov 128   ;;  %s2575_s13 = smov 8   ;;  %v2437_v45 = vld [vmem:[%s2701_s19 + $0x20] sm:$0xff]  ;;  %v2438_v39 = vld [vmem:[%s2701_s19 + $0x30] sm:$0xff]  ;;  %v2439_v54 = vld [vmem:[%s2701_s19 + $0x28] sm:$0xff] }
 0x730   : > { %2122 = dma.vmem_to_hbm [thread:$0]  (%p2659_p11), %s1844_s24, 8192, %s1846_s26, %s1812_s27, %s2574_s15, %s2574_s15, %s2575_s13  }
 0x731   : > { %s2116_s0 = sshll.u32 %s2630_s3, 6  ;;  %s1825_s24 = sshll.u32 %s2967_s14, 4  ;;  %v2440_v40 = vld [vmem:[%s2701_s19 + $0x38] sm:$0xff]  ;;  %s1826_s24 = int_to_ptr.vmem [resolvable:$true] %s1825_s24 }
 0x732   : > { %s1824_s18 = scalar_lea.hbm %s3618_s4, %s2116_s0  ;;  %s1807_s3 = scalar_lea.sflag [#allocation5], %s2695_s12 }
 0x733   : > { %s1827_s26 = sshll.u32 %s1824_s18, 4  ;;  %s2519_s8 = scalar_lea.hbm %s3618_s4, 128  ;;  %s1828_s26 = int_to_ptr.hbm [resolvable:$true] %s1827_s26 }
 0x734   : > { %s2513_s27 = sshra.s32 %s1828_s26, 4  ;;  %s2514_s27 = int_to_ptr.hbm [resolvable:$true] %s2513_s27 }
 0x735   : > { %s2515_s29 = scalar_lea.hbm %s2514_s27, 64  ;;  %p2520_p10 = scmp.lt.s32.totalorder %s2514_s27, %s3618_s4 }
 0x736   : > { %p2516_p7 = scmp.ne.s32.totalorder %s2514_s27, %s2515_s29  ;;  %p2521_p2 = scmp.lt.s32.totalorder %s2519_s8, %s2515_s29 }
 0x738   : > { %p2517_p5 = pnand %p2516_p7, %p2659_p11  ;;  %p2522_p6 = por %p2521_p2, %p2520_p10 }
 0x73a   : > { %p2518_p8 = pneg %p2517_p5 }
 0x73c   : > { %p2523_p9 = pnand %p2522_p6, %p2518_p8 }
 0x79c   : > { %v1398_v46 = vpop.f32.mrf.mxu0 }
 0x79d   : > { %v1404_v27 = vmul.f32 %v1398_v46, %v3640_v61 }
 0x79f   : > { %v1406_v57 = vadd.f32 %v2437_v45, %v1404_v27 }
 0x7a1   : > { %2045 = vst [vmem:[%s2967_s14 + $0x20] sm:$0xff] %v1406_v57 }
 0x7a2   : > { %v1776_v36 = vpop.f32.mrf.mxu1 }
 0x7a3   : > { %v1782_v7 = vmul.f32 %v1776_v36, %v3640_v61 }
 0x7a4   : > { %v1401_v13 = vpop.f32.mrf.mxu0 }
 0x7a5   : > { %v1784_v3 = vadd.f32 %v2438_v39, %v1782_v7  ;;  %v1405_v28 = vmul.f32 %v1401_v13, %v3640_v61 }
 0x7a7   : > { %2085 = vst [vmem:[%s2967_s14 + $0x30] sm:$0xff] %v1784_v3  ;;  %v1407_v59 = vadd.f32 %v2439_v54, %v1405_v28 }
 0x7a9   : > { %2046 = vst [vmem:[%s2967_s14 + $0x28] sm:$0xff] %v1407_v59 }
 0x7aa   : > { %v1779_v21 = vpop.f32.mrf.mxu1 }
 0x7ab   : > { %v1783_v26 = vmul.f32 %v1779_v21, %v3640_v61 }
 0x7ad   : > { %v1785_v63 = vadd.f32 %v2440_v40, %v1783_v26 }
 0x7af   : > { %2086 = vst [vmem:[%s2967_s14 + $0x38] sm:$0xff] %v1785_v63 }
 0x7b0   : > { %2526 = shalt.err (!%p2523_p9)
}
 0x7b1   : > { %2121 = dma.vmem_to_hbm [thread:$0]  (%p2659_p11), %s1826_s24, 1024, %s1828_s26, %s1807_s3, %s2574_s15, %s2574_s15, %s2575_s13  }
 0x7b2 PF: > { %s1860_s12 = sand.u32 1, %s2557_s20   ;;  %p3648_p13 = scmp.ge.s32.totalorder %s2569_s23, 2 }
 0x7b3   : > { %s1861_s19 = scalar_lea.sflag [#allocation5], %s1860_s12 }
 0x7b4   : > { %p2130_p0 = pnand %p3648_p13, %p2663_p12 }
 0x7b6   : > { %p2131_p1 = pneg %p2130_p0 }
 0x7b8   : > { %2548 = dma.done.wait (%p2131_p1), %s1861_s19, 1024  }
 0x7b9   : > { %2550 = vsyncadd (%p2131_p1), %s1861_s19, 4294966272  ;;  %s1871_s14 = scalar_lea.sflag [#allocation8], %s1860_s12 }
 0x7ba   : > { %2552 = dma.done.wait (%p2131_p1), %s1871_s14, 8192  }
 0x7bb   : > { %2554 = vsyncadd (%p2131_p1), %s1871_s14, 4294959104  ;;  %p23_p11 = scmp.ge.s32.totalorder %s2634_s25, 4   ;;  %s3649_s20 = smov %s2561_s21 }
 0x7bc   : > { %s3650_s21 = smov %s2565_s22  ;;  %s3651_s22 = smov %s2646_s28 }
 0x7bd   : > { %s3652_s23 = smov %s2634_s25  ;;  %25 = sbr.rel (!%p23_p11) target bundleno = 10 (0xa), region = 107 }
 0x7c2   :  { %1877 = vsyncpa [#allocation4], 1 }
 0x7c3   :  { %1879 = vsyncpa [#allocation4 + $0x1], 1 }
 0x7c4   :  { %1880 = vsyncpa [#allocation5], 1 }
 0x7c5   :  { %1882 = vsyncpa [#allocation5 + $0x1], 1 }
 0x7c6   :  { %1883 = vsyncpa [#allocation8], 1 }
 0x7c7   :  { %1885 = vsyncpa [#allocation8 + $0x1], 1 }

</bundles_post_ra>
